<compile_context>
chip_gen: v6e
topology: v6e:2x2x1
jax: 0.10.0
libtpu: 0.0.40
codegen_flags: <defaults>
</compile_context>

<pallas_src>
import functools
import math

import jax
import jax.numpy as jnp
import numpy as np
from jax.experimental import pallas as pl
from jax.experimental.pallas import tpu as pltpu


# ----------------------------- kernel ----------------------------------------

def _group_norm_kernel(*refs, inv_d, eps, is_rms_norm, has_res, has_bias, prenorm):
    """One row-tile of fused (residual add +) GroupNorm / GroupRMSNorm (+affine)."""
    it = iter(refs)
    x_ref = next(it)                                   # (bt, Hf) input
    res_ref = next(it) if has_res else None            # (bt, Hf) residual
    m_mem_ref = next(it)                               # (Hf, Gf) 0/1 membership
    m_bc01_ref = None if is_rms_norm else next(it)     # (Gf, Hf) 0/1 broadcast
    m_bcw_ref = next(it)                               # (Gf, Hf) weight-folded broadcast
    b_ref = next(it) if has_bias else None             # (1, Hf) bias row
    o_ref = next(it)                                   # (bt, Hf) output
    r_out_ref = next(it) if prenorm else None          # (bt, Hf) f32 residual out

    x = x_ref[...].astype(jnp.float32)
    if has_res:
        x = x + res_ref[...].astype(jnp.float32)
    if prenorm:
        r_out_ref[...] = x                             # prenorm residual, f32

    hi = jax.lax.Precision.HIGHEST
    m_mem = m_mem_ref[...]

    if is_rms_norm:
        xbar = x
    else:
        # Per-(row, group) mean through the MXU; 1/D applied on the tiny side.
        mean_g = jnp.dot(x, m_mem, precision=hi,
                         preferred_element_type=jnp.float32) * inv_d      # (bt, Gf)
        mean_b = jnp.dot(mean_g, m_bc01_ref[...], precision=hi,
                         preferred_element_type=jnp.float32)              # (bt, Hf)
        xbar = x - mean_b

    var_g = jnp.dot(xbar * xbar, m_mem, precision=hi,
                    preferred_element_type=jnp.float32) * inv_d           # (bt, Gf)
    rstd_g = jax.lax.rsqrt(var_g + eps)                                   # (bt, Gf)

    # Affine folded into the broadcast matmul: a_b[r, c] = rstd[r, g(c)] * w[c].
    a_b = jnp.dot(rstd_g, m_bcw_ref[...], precision=hi,
                  preferred_element_type=jnp.float32)                     # (bt, Hf)
    y = xbar * a_b
    if has_bias:
        y = y + b_ref[...].astype(jnp.float32)
    o_ref[...] = y.astype(o_ref.dtype)


# ----------------------------- helpers ----------------------------------------

def _round_up(x, m):
    return ((x + m - 1) // m) * m


def _fold_factor(h):
    """Rows folded into the lane axis so the lane width is a multiple of 128."""
    return 128 // math.gcd(h, 128)


def _vmem_limit_bytes():
    cap = 64 << 20
    try:
        info = pltpu.get_tpu_info()
        cap = int(getattr(info, "vmem_capacity_bytes", cap)) or cap
    except Exception:
        pass
    # ~half of physical VMEM: v5e/v6e (128 MiB) -> 64 MiB, v7x (64 MiB) -> 32 MiB.
    return int(max(16 << 20, cap // 2))


def _num_tensorcores():
    try:
        info = pltpu.get_tpu_info()
        for attr in ("num_cores", "num_tensorcores", "tensorcore_count", "core_count"):
            v = getattr(info, attr, None)
            if isinstance(v, int) and v > 0:
                return v
    except Exception:
        pass
    return 1


def _pick_block_rows(t_rows, h_lanes, stream_bytes, budget_bytes, multi_tc):
    """Largest row tile (multiple of 8) whose working set fits the VMEM budget."""
    per_row = h_lanes * stream_bytes
    bt = budget_bytes // max(per_row, 1)
    bt = min(bt, 1024 if multi_tc else 512)       # HBM-roofline plateau
    if multi_tc:
        # keep >=~4 grid steps only when a second TensorCore can use them
        bt = min(bt, _round_up(pl.cdiv(t_rows, 4), 8))
    bt = max(8, (bt // 8) * 8)
    if bt >= t_rows:
        return int(t_rows)                        # single exact block
    return int(bt)


@functools.lru_cache(maxsize=None)
def _group_masks(h, num_groups, fold):
    """Cached 0/1 group-membership masks for the row-folded (T/k, k*H) layout."""
    d = h // num_groups
    hf, gf = h * fold, num_groups * fold
    lane = np.arange(hf)
    gidx = (lane // h) * num_groups + (lane % h) // d           # group instance per lane
    mem = (gidx[:, None] == np.arange(gf)[None, :]).astype(np.float32)   # (Hf, Gf)
    bc01 = np.ascontiguousarray(mem.T)                                   # (Gf, Hf)
    return jnp.asarray(mem), jnp.asarray(bc01)


# ----------------------------- core call --------------------------------------

def _group_norm_call(x, residual, m_mem, m_bc01, m_bcw, b_row, *,
                     num_groups, fold, eps, is_rms_norm, prenorm):
    orig_dtype = x.dtype
    x_shape = x.shape
    h = x_shape[-1]
    d = h // num_groups

    x2 = x.reshape(-1, h)
    t = x2.shape[0]
    res2 = residual.reshape(-1, h) if residual is not None else None

    # Pad a few rows so the row fold keeps the lane axis a 128-multiple
    # (unmasked lane-dense stores); pad rows are independent and dropped after.
    t_pad = _round_up(max(t, 1), fold)
    if t_pad != t:
        x2 = jnp.pad(x2, ((0, t_pad - t), (0, 0)))
        if res2 is not None:
            res2 = jnp.pad(res2, ((0, t_pad - t), (0, 0)))

    hf = h * fold
    gf = num_groups * fold
    tf = t_pad // fold
    x2 = x2.reshape(tf, hf)
    if res2 is not None:
        res2 = res2.reshape(tf, hf)

    has_res = res2 is not None
    has_bias = b_row is not None

    # --- VMEM-budgeted row tile -------------------------------------------------
    vmem_limit = _vmem_limit_bytes()
    const_bytes = (m_mem.size + m_bcw.size) * 4
    if not is_rms_norm:
        const_bytes += m_bc01.size * 4
    if has_bias:
        const_bytes += hf * 4
    in_b = jnp.dtype(x2.dtype).itemsize
    out_b = jnp.dtype(orig_dtype).itemsize
    stream = 2 * in_b + 2 * out_b + 6 * 4          # dbl-buffered I/O + ~6 live f32 temps
    if has_res:
        stream += 2 * jnp.dtype(res2.dtype).itemsize
    if prenorm:
        stream += 2 * 4                            # f32 residual output, dbl-buffered
    budget = int(vmem_limit * 0.75) - 2 * const_bytes
    multi_tc = _num_tensorcores() > 1
    bt = _pick_block_rows(tf, hf, stream, max(budget, 1 << 20), multi_tc)

    kernel = functools.partial(
        _group_norm_kernel, inv_d=1.0 / d, eps=float(eps),
        is_rms_norm=is_rms_norm, has_res=has_res, has_bias=has_bias,
        prenorm=prenorm)

    def _const_spec(shape, single_buffer):
        idx = lambda i: (0,) * len(shape)
        if single_buffer:
            try:
                return pl.BlockSpec(shape, idx, pipeline_mode=pl.Buffered(1))
            except TypeError:
                pass
        return pl.BlockSpec(shape, idx)

    def _call(single_buffer):
        inputs = [x2]
        in_specs = [pl.BlockSpec((bt, hf), lambda i: (i, 0))]
        if has_res:
            inputs.append(res2)
            in_specs.append(pl.BlockSpec((bt, hf), lambda i: (i, 0)))
        inputs.append(m_mem)
        in_specs.append(_const_spec((hf, gf), single_buffer))
        if not is_rms_norm:
            inputs.append(m_bc01)
            in_specs.append(_const_spec((gf, hf), single_buffer))
        inputs.append(m_bcw)
        in_specs.append(_const_spec((gf, hf), single_buffer))
        if has_bias:
            inputs.append(b_row)
            in_specs.append(_const_spec((1, hf), single_buffer))

        if prenorm:
            out_shape = (jax.ShapeDtypeStruct((tf, hf), orig_dtype),
                         jax.ShapeDtypeStruct((tf, hf), jnp.float32))
            out_specs = (pl.BlockSpec((bt, hf), lambda i: (i, 0)),
                         pl.BlockSpec((bt, hf), lambda i: (i, 0)))
        else:
            out_shape = jax.ShapeDtypeStruct((tf, hf), orig_dtype)
            out_specs = pl.BlockSpec((bt, hf), lambda i: (i, 0))

        return pl.pallas_call(
            kernel,
            out_shape=out_shape,
            grid_spec=pltpu.PrefetchScalarGridSpec(
                num_scalar_prefetch=0,
                grid=(pl.cdiv(tf, bt),),
                in_specs=in_specs,
                out_specs=out_specs),
            compiler_params=pltpu.CompilerParams(
                dimension_semantics=("parallel",),
                vmem_limit_bytes=vmem_limit),
        )(*inputs)

    try:
        result = _call(True)
    except Exception:
        # fall back if single-buffered constants are not supported on this jax
        result = _call(False)

    def _unfold(a):
        a = a.reshape(t_pad, h)
        if t_pad != t:
            a = a[:t]
        return a.reshape(x_shape)

    if prenorm:
        y2, r2 = result
        return _unfold(y2), _unfold(r2)
    return _unfold(result)


# ----------------------------- public wrappers --------------------------------

def group_norm_pallas(x, weight=None, bias=None, *, num_groups=1, eps=1e-5,
                      is_rms_norm=False, residual=None, prenorm=False):
    """Forward pass of fla GroupNorm (upcast=True) using a Pallas TPU kernel."""
    h = x.shape[-1]
    if h % num_groups != 0:
        raise ValueError("num_channels must be divisible by num_groups")
    fold = _fold_factor(h)
    m_mem, m_bc01 = _group_masks(h, num_groups, fold)
    if weight is not None:
        m_bcw = m_bc01 * jnp.tile(weight.astype(jnp.float32).reshape(-1), fold)[None, :]
    else:
        m_bcw = m_bc01
    b_row = (jnp.tile(bias.astype(jnp.float32).reshape(-1), fold).reshape(1, h * fold)
             if bias is not None else None)
    return _group_norm_call(x, residual, m_mem, m_bc01, m_bcw, b_row,
                            num_groups=num_groups, fold=fold, eps=eps,
                            is_rms_norm=is_rms_norm, prenorm=prenorm)


class GroupNorm:
    """JAX mirror of fla.modules.layernorm.GroupNormRef (forward only)."""

    def __init__(self, num_groups, hidden_size, elementwise_affine=True,
                 bias=False, eps=1e-5, is_rms_norm=False):
        if hidden_size % num_groups != 0:
            raise ValueError("num_channels must be divisible by num_groups")
        self.num_groups = num_groups
        self.hidden_size = hidden_size
        self.eps = eps
        self.is_rms_norm = is_rms_norm
        self.elementwise_affine = elementwise_affine
        # reset_parameters(): weight = ones, bias = zeros (if enabled)
        self.weight = jnp.ones((hidden_size,), jnp.float32) if elementwise_affine else None
        self.bias = (jnp.zeros((hidden_size,), jnp.float32)
                     if (elementwise_affine and bias) else None)
        # Precompute fold factor, cached 0/1 masks and the weight-folded
        # broadcast mask / tiled bias once (no per-call mask rebuilds).
        self._fold = _fold_factor(hidden_size)
        self._m_mem, self._m_bc01 = _group_masks(hidden_size, num_groups, self._fold)
        if self.weight is not None:
            self._m_bcw = self._m_bc01 * jnp.tile(self.weight, self._fold)[None, :]
        else:
            self._m_bcw = self._m_bc01
        self._b_row = (jnp.tile(self.bias, self._fold).reshape(1, hidden_size * self._fold)
                       if self.bias is not None else None)

    def __call__(self, x, residual=None, prenorm=False):
        return _group_norm_call(x, residual, self._m_mem, self._m_bc01,
                                self._m_bcw, self._b_row,
                                num_groups=self.num_groups, fold=self._fold,
                                eps=self.eps, is_rms_norm=self.is_rms_norm,
                                prenorm=prenorm)


# ----------------------------- reference / test --------------------------------

def _reference_group_norm(x, weight, bias, num_groups, eps, is_rms_norm,
                          residual=None, prenorm=False):
    dtype = x.dtype
    xf = x.astype(jnp.float32)
    if residual is not None:
        xf = xf + residual.astype(jnp.float32)
    resid = xf
    shp = xf.shape
    h = shp[-1]
    d = h // num_groups
    xg = xf.reshape(-1, num_groups, d)
    if not is_rms_norm:
        xg = xg - jnp.mean(xg, axis=-1, keepdims=True)
    rstd = jax.lax.rsqrt(jnp.mean(xg * xg, axis=-1, keepdims=True) + eps)
    y = (xg * rstd).reshape(-1, h)
    if weight is not None:
        y = y * weight.astype(jnp.float32)
    if bias is not None:
        y = y + bias.astype(jnp.float32)
    y = y.reshape(shp).astype(dtype)
    return (y, resid) if prenorm else y


if __name__ == "__main__":
    key = jax.random.PRNGKey(0)
    k1, k2, k3, k4, k5, k6 = jax.random.split(key, 6)

    # Config 1 (module): hidden=32 not a multiple of 128 -> row-folding (fold=4).
    batch, seq, hidden, groups = 2, 8, 32, 4
    x1 = jax.random.normal(k1, (batch, seq, hidden), dtype=jnp.float32)
    gn1 = GroupNorm(num_groups=groups, hidden_size=hidden,
                    elementwise_affine=True, bias=False, eps=1e-5, is_rms_norm=False)
    y1 = jax.block_until_ready(gn1(x1))
    y1_ref = _reference_group_norm(x1, gn1.weight, gn1.bias, groups, gn1.eps, False)
    assert y1.shape == x1.shape and y1.dtype == x1.dtype
    assert jnp.allclose(y1, y1_ref, atol=1e-3, rtol=1e-3)

    # Config 2 (functional): D % 128 == 0 (MXU mask path used everywhere now),
    # RMS norm with random weight & bias, row count not aligned to the row tile.
    b2, s2, h2, g2 = 2, 9, 256, 2
    x2 = jax.random.normal(k2, (b2, s2, h2), dtype=jnp.float32)
    w2 = jax.random.normal(k5, (h2,), dtype=jnp.float32)
    bb2 = jax.random.normal(k6, (h2,), dtype=jnp.float32)
    y2 = jax.block_until_ready(
        group_norm_pallas(x2, w2, bb2, num_groups=g2, eps=1e-5, is_rms_norm=True))
    y2_ref = _reference_group_norm(x2, w2, bb2, g2, 1e-5, True)
    assert y2.shape == x2.shape and y2.dtype == x2.dtype
    assert jnp.allclose(y2, y2_ref, atol=1e-3, rtol=1e-3)

    # Config 3 (module): fused residual + prenorm (f32 residual output),
    # hidden=48 -> fold=8 with t=18 not a multiple of 8 -> row-padding path.
    b3, s3, h3, g3 = 2, 9, 48, 4
    x3 = jax.random.normal(k3, (b3, s3, h3), dtype=jnp.float32)
    r3 = jax.random.normal(k4, (b3, s3, h3), dtype=jnp.float32)
    gn3 = GroupNorm(num_groups=g3, hidden_size=h3, elementwise_affine=True,
                    bias=True, eps=1e-5, is_rms_norm=False)
    y3, res3 = gn3(x3, residual=r3, prenorm=True)
    y3 = jax.block_until_ready(y3)
    res3 = jax.block_until_ready(res3)
    y3_ref, res3_ref = _reference_group_norm(x3, gn3.weight, gn3.bias, g3, gn3.eps,
                                             False, residual=r3, prenorm=True)
    assert y3.shape == x3.shape and y3.dtype == x3.dtype
    assert res3.shape == x3.shape and res3.dtype == jnp.float32
    assert jnp.allclose(y3, y3_ref, atol=1e-3, rtol=1e-3)
    assert jnp.allclose(res3, res3_ref, atol=1e-6, rtol=1e-6)

    print("KERNEL_OK")
</pallas_src>

<mosaic_0001>
module attributes {stable_mosaic.version = 11 : i64} {
  func.func @_group_norm_kernel(%arg0: i32, %arg1: memref<4x128xf32, #tpu.memory_space<vmem>>, %arg2: memref<128x16xf32, #tpu.memory_space<vmem>>, %arg3: memref<16x128xf32, #tpu.memory_space<vmem>>, %arg4: memref<16x128xf32, #tpu.memory_space<vmem>>, %arg5: memref<4x128xf32, #tpu.memory_space<vmem>>) attributes {dimension_semantics = [#tpu.dimension_semantics<parallel>], iteration_bounds = array<i64: 1>, scalar_prefetch = 0 : i64, scratch_operands = 0 : i64, tpu.core_type = #tpu.core_type<tc>, window_params = [{transform_indices = @transform_0, window_bounds = array<i64: 4, 128>}, {pipeline_mode = #tpu.pipeline_mode<synchronous>, transform_indices = @transform_1, window_bounds = array<i64: 128, 16>}, {pipeline_mode = #tpu.pipeline_mode<synchronous>, transform_indices = @transform_2, window_bounds = array<i64: 16, 128>}, {pipeline_mode = #tpu.pipeline_mode<synchronous>, transform_indices = @transform_3, window_bounds = array<i64: 16, 128>}, {transform_indices = @transform_4, window_bounds = array<i64: 4, 128>}]} {
    %c0 = arith.constant 0 : index
    %c0_0 = arith.constant 0 : index
    %0 = vector.load %arg1[%c0, %c0_0] : memref<4x128xf32, #tpu.memory_space<vmem>>, vector<4x128xf32>
    %c0_1 = arith.constant 0 : index
    %c0_2 = arith.constant 0 : index
    %1 = vector.load %arg2[%c0_1, %c0_2] : memref<128x16xf32, #tpu.memory_space<vmem>>, vector<128x16xf32>
    %cst = arith.constant dense<0.000000e+00> : vector<4x16xf32>
    %2 = tpu.matmul %0, %1, %cst {dimension_numbers = #tpu.dot_dimension_numbers<[1], [0], [0], [1], [0, 0, 1, 1], [], []>, precision = #tpu.contract_precision<fp32>} : vector<4x128xf32>, vector<128x16xf32>, vector<4x16xf32> -> vector<4x16xf32>
    %cst_3 = arith.constant 1.250000e-01 : f32
    %3 = vector.broadcast %cst_3 : f32 to vector<4x16xf32>
    %4 = arith.mulf %2, %3 : vector<4x16xf32>
    %c0_4 = arith.constant 0 : index
    %c0_5 = arith.constant 0 : index
    %5 = vector.load %arg3[%c0_4, %c0_5] : memref<16x128xf32, #tpu.memory_space<vmem>>, vector<16x128xf32>
    %cst_6 = arith.constant dense<0.000000e+00> : vector<4x128xf32>
    %6 = tpu.matmul %4, %5, %cst_6 {dimension_numbers = #tpu.dot_dimension_numbers<[1], [0], [0], [1], [0, 0, 1, 1], [], []>, precision = #tpu.contract_precision<fp32>} : vector<4x16xf32>, vector<16x128xf32>, vector<4x128xf32> -> vector<4x128xf32>
    %7 = arith.subf %0, %6 : vector<4x128xf32>
    %8 = arith.mulf %7, %7 : vector<4x128xf32>
    %cst_7 = arith.constant dense<0.000000e+00> : vector<4x16xf32>
    %9 = tpu.matmul %8, %1, %cst_7 {dimension_numbers = #tpu.dot_dimension_numbers<[1], [0], [0], [1], [0, 0, 1, 1], [], []>, precision = #tpu.contract_precision<fp32>} : vector<4x128xf32>, vector<128x16xf32>, vector<4x16xf32> -> vector<4x16xf32>
    %cst_8 = arith.constant 1.250000e-01 : f32
    %10 = vector.broadcast %cst_8 : f32 to vector<4x16xf32>
    %11 = arith.mulf %9, %10 : vector<4x16xf32>
    %cst_9 = arith.constant 9.99999974E-6 : f32
    %12 = vector.broadcast %cst_9 : f32 to vector<4x16xf32>
    %13 = arith.addf %11, %12 : vector<4x16xf32>
    %14 = math.rsqrt %13 : vector<4x16xf32>
    %c0_10 = arith.constant 0 : index
    %c0_11 = arith.constant 0 : index
    %15 = vector.load %arg4[%c0_10, %c0_11] : memref<16x128xf32, #tpu.memory_space<vmem>>, vector<16x128xf32>
    %cst_12 = arith.constant dense<0.000000e+00> : vector<4x128xf32>
    %16 = tpu.matmul %14, %15, %cst_12 {dimension_numbers = #tpu.dot_dimension_numbers<[1], [0], [0], [1], [0, 0, 1, 1], [], []>, precision = #tpu.contract_precision<fp32>} : vector<4x16xf32>, vector<16x128xf32>, vector<4x128xf32> -> vector<4x128xf32>
    %17 = arith.mulf %7, %16 : vector<4x128xf32>
    %c0_13 = arith.constant 0 : index
    %c0_14 = arith.constant 0 : index
    %18 = vector.load %arg5[%c0_13, %c0_14] : memref<4x128xf32, #tpu.memory_space<vmem>>, vector<4x128xf32>
    tpu.vector_store %arg5[%c0_13, %c0_14], %17 {strides = array<i32>} : memref<4x128xf32, #tpu.memory_space<vmem>>, vector<4x128xf32>,
    return
  }
  func.func @transform_0(%arg0: i32) -> (i32, i32) {
    %c0_i32 = arith.constant 0 : i32
    %c0_i32_0 = arith.constant 0 : i32
    return %arg0, %c0_i32 : i32, i32
  }
  func.func @transform_1(%arg0: i32) -> (i32, i32) {
    %c0_i32 = arith.constant 0 : i32
    %c0_i32_0 = arith.constant 0 : i32
    %c0_i32_1 = arith.constant 0 : i32
    return %c0_i32, %c0_i32_0 : i32, i32
  }
  func.func @transform_2(%arg0: i32) -> (i32, i32) {
    %c0_i32 = arith.constant 0 : i32
    %c0_i32_0 = arith.constant 0 : i32
    %c0_i32_1 = arith.constant 0 : i32
    return %c0_i32, %c0_i32_0 : i32, i32
  }
  func.func @transform_3(%arg0: i32) -> (i32, i32) {
    %c0_i32 = arith.constant 0 : i32
    %c0_i32_0 = arith.constant 0 : i32
    %c0_i32_1 = arith.constant 0 : i32
    return %c0_i32, %c0_i32_0 : i32, i32
  }
  func.func @transform_4(%arg0: i32) -> (i32, i32) {
    %c0_i32 = arith.constant 0 : i32
    %c0_i32_0 = arith.constant 0 : i32
    return %arg0, %c0_i32 : i32, i32
  }
}

module attributes {stable_mosaic.version = 11 : i64} {
  func.func @_group_norm_kernel(%arg0: i32, %arg1: memref<4x128xf32, #tpu.memory_space<vmem>>, %arg2: memref<128x16xf32, #tpu.memory_space<vmem>>, %arg3: memref<16x128xf32, #tpu.memory_space<vmem>>, %arg4: memref<16x128xf32, #tpu.memory_space<vmem>>, %arg5: memref<4x128xf32, #tpu.memory_space<vmem>>) attributes {dimension_semantics = [#tpu.dimension_semantics<parallel>], iteration_bounds = array<i64: 1>, scalar_prefetch = 0 : i64, scratch_operands = 0 : i64, tpu.core_type = #tpu.core_type<tc>, window_params = [{transform_indices = @transform_0, window_bounds = array<i64: 4, 128>}, {pipeline_mode = #tpu.pipeline_mode<synchronous>, transform_indices = @transform_1, window_bounds = array<i64: 128, 16>}, {pipeline_mode = #tpu.pipeline_mode<synchronous>, transform_indices = @transform_2, window_bounds = array<i64: 16, 128>}, {pipeline_mode = #tpu.pipeline_mode<synchronous>, transform_indices = @transform_3, window_bounds = array<i64: 16, 128>}, {transform_indices = @transform_4, window_bounds = array<i64: 4, 128>}]} {
    %c0 = arith.constant 0 : index
    %c0_0 = arith.constant 0 : index
    %0 = vector.load %arg1[%c0, %c0_0] : memref<4x128xf32, #tpu.memory_space<vmem>>, vector<4x128xf32>
    %c0_1 = arith.constant 0 : index
    %c0_2 = arith.constant 0 : index
    %1 = vector.load %arg2[%c0_1, %c0_2] : memref<128x16xf32, #tpu.memory_space<vmem>>, vector<128x16xf32>
    %cst = arith.constant dense<0.000000e+00> : vector<4x16xf32>
    %2 = tpu.matmul %0, %1, %cst {dimension_numbers = #tpu.dot_dimension_numbers<[1], [0], [0], [1], [0, 0, 1, 1], [], []>, precision = #tpu.contract_precision<fp32>} : vector<4x128xf32>, vector<128x16xf32>, vector<4x16xf32> -> vector<4x16xf32>
    %cst_3 = arith.constant 1.250000e-01 : f32
    %3 = vector.broadcast %cst_3 : f32 to vector<4x16xf32>
    %4 = arith.mulf %2, %3 : vector<4x16xf32>
    %c0_4 = arith.constant 0 : index
    %c0_5 = arith.constant 0 : index
    %5 = vector.load %arg3[%c0_4, %c0_5] : memref<16x128xf32, #tpu.memory_space<vmem>>, vector<16x128xf32>
    %cst_6 = arith.constant dense<0.000000e+00> : vector<4x128xf32>
    %6 = tpu.matmul %4, %5, %cst_6 {dimension_numbers = #tpu.dot_dimension_numbers<[1], [0], [0], [1], [0, 0, 1, 1], [], []>, precision = #tpu.contract_precision<fp32>} : vector<4x16xf32>, vector<16x128xf32>, vector<4x128xf32> -> vector<4x128xf32>
    %7 = arith.subf %0, %6 : vector<4x128xf32>
    %8 = arith.mulf %7, %7 : vector<4x128xf32>
    %cst_7 = arith.constant dense<0.000000e+00> : vector<4x16xf32>
    %9 = tpu.matmul %8, %1, %cst_7 {dimension_numbers = #tpu.dot_dimension_numbers<[1], [0], [0], [1], [0, 0, 1, 1], [], []>, precision = #tpu.contract_precision<fp32>} : vector<4x128xf32>, vector<128x16xf32>, vector<4x16xf32> -> vector<4x16xf32>
    %cst_8 = arith.constant 1.250000e-01 : f32
    %10 = vector.broadcast %cst_8 : f32 to vector<4x16xf32>
    %11 = arith.mulf %9, %10 : vector<4x16xf32>
    %cst_9 = arith.constant 9.99999974E-6 : f32
    %12 = vector.broadcast %cst_9 : f32 to vector<4x16xf32>
    %13 = arith.addf %11, %12 : vector<4x16xf32>
    %14 = math.rsqrt %13 : vector<4x16xf32>
    %c0_10 = arith.constant 0 : index
    %c0_11 = arith.constant 0 : index
    %15 = vector.load %arg4[%c0_10, %c0_11] : memref<16x128xf32, #tpu.memory_space<vmem>>, vector<16x128xf32>
    %cst_12 = arith.constant dense<0.000000e+00> : vector<4x128xf32>
    %16 = tpu.matmul %14, %15, %cst_12 {dimension_numbers = #tpu.dot_dimension_numbers<[1], [0], [0], [1], [0, 0, 1, 1], [], []>, precision = #tpu.contract_precision<fp32>} : vector<4x16xf32>, vector<16x128xf32>, vector<4x128xf32> -> vector<4x128xf32>
    %17 = arith.mulf %7, %16 : vector<4x128xf32>
    %c0_13 = arith.constant 0 : index
    %c0_14 = arith.constant 0 : index
    %18 = vector.load %arg5[%c0_13, %c0_14] : memref<4x128xf32, #tpu.memory_space<vmem>>, vector<4x128xf32>
    tpu.vector_store %arg5[%c0_13, %c0_14], %17 {strides = array<i32>} : memref<4x128xf32, #tpu.memory_space<vmem>>, vector<4x128xf32>,
    return
  }
  func.func @transform_0(%arg0: i32) -> (i32, i32) {
    %c0_i32 = arith.constant 0 : i32
    %c0_i32_0 = arith.constant 0 : i32
    return %arg0, %c0_i32 : i32, i32
  }
  func.func @transform_1(%arg0: i32) -> (i32, i32) {
    %c0_i32 = arith.constant 0 : i32
    %c0_i32_0 = arith.constant 0 : i32
    %c0_i32_1 = arith.constant 0 : i32
    return %c0_i32, %c0_i32_0 : i32, i32
  }
  func.func @transform_2(%arg0: i32) -> (i32, i32) {
    %c0_i32 = arith.constant 0 : i32
    %c0_i32_0 = arith.constant 0 : i32
    %c0_i32_1 = arith.constant 0 : i32
    return %c0_i32, %c0_i32_0 : i32, i32
  }
  func.func @transform_3(%arg0: i32) -> (i32, i32) {
    %c0_i32 = arith.constant 0 : i32
    %c0_i32_0 = arith.constant 0 : i32
    %c0_i32_1 = arith.constant 0 : i32
    return %c0_i32, %c0_i32_0 : i32, i32
  }
  func.func @transform_4(%arg0: i32) -> (i32, i32) {
    %c0_i32 = arith.constant 0 : i32
    %c0_i32_0 = arith.constant 0 : i32
    return %arg0, %c0_i32 : i32, i32
  }
}

</mosaic_0001>

<bundles_post_ra>
// kernel: tpu_custom_call.1
= control target key start
LH: loop header
LB: loop body
LE: loop exit
PB: predicated region body
PF: predicated region fallthrough
CT: control target
= control target key end

     0   :  { %v3860_v3 = vmov 0.0   ;;  %vm3040_vm0 = vmmov 0   ;;  %s3829_s0 = inlined_call_operand.vmem [shape: f32[4,128], index: 0, kind: input, shape index: {}]   ;;  %s3830_s1 = inlined_call_operand.vmem [shape: f32[128,16], index: 1, kind: input, shape index: {}]   ;;  %s3831_s2 = inlined_call_operand.vmem [shape: f32[16,128], index: 2, kind: input, shape index: {}]   ;;  %s3832_s3 = inlined_call_operand.vmem [shape: f32[16,128], index: 3, kind: input, shape index: {}]   ;;  %s3833_s4 = inlined_call_operand.hbm [shape: f32[4,128], index: 4, kind: output, shape index: {}]  }
   0x1   :  { %v34_v0 = vld [vmem:[%s3830_s1 + $0x78] sm:$0xff]  ;;  %v33_v1 = vld [vmem:[%s3830_s1 + $0x70] sm:$0xff]  ;;  %v32_v2 = vld [vmem:[%s3830_s1 + $0x68] sm:$0xff]  ;;  %2508 = vmatprep.subr.mxu0 %v3860_v3  ;;  %2543 = vmatprep.subr.mxu1 %v3860_v3 }
   0x2   :  { %v3077_v4 = vand.u32 4294901760, %v34_v0  ;;  %v3079_v5 = vand.u32 4294901760, %v33_v1  ;;  %v3081_v6 = vand.u32 4294901760, %v32_v2  ;;  %v31_v7 = vld [vmem:[%s3830_s1 + $0x60] sm:$0xff]  ;;  %v30_v8 = vld [vmem:[%s3830_s1 + $0x58] sm:$0xff]  ;;  %v29_v9 = vld [vmem:[%s3830_s1 + $0x50] sm:$0xff]  ;;  %2540 = vmatprep.mubr.msk.f32.mxu0 %vm3040_vm0, %v3860_v3  ;;  %2575 = vmatprep.mubr.msk.f32.mxu1 %vm3040_vm0, %v3860_v3 }
   0x3   :  { %v3093_v10 = vand.u32 4294901760, %v31_v7  ;;  %v3095_v11 = vand.u32 4294901760, %v30_v8  ;;  %v3097_v12 = vand.u32 4294901760, %v29_v9  ;;  %v28_v13 = vld [vmem:[%s3830_s1 + $0x48] sm:$0xff]  ;;  %v27_v14 = vld [vmem:[%s3830_s1 + $0x40] sm:$0xff]  ;;  %v26_v19 = vld [vmem:[%s3830_s1 + $0x38] sm:$0xff] }
   0x4   :  { %2509 = vmatpush3.msra.mxu0 %v3077_v4  ;;  %v3111_v15 = vsub.f32 %v34_v0, %v3077_v4  ;;  %v3114_v16 = vsub.f32 %v33_v1, %v3079_v5  ;;  %v3116_v17 = vand.u32 4294901760, %v28_v13  ;;  %v3119_v18 = vsub.f32 %v32_v2, %v3081_v6  ;;  %v25_v26 = vld [vmem:[%s3830_s1 + $0x30] sm:$0xff] }
   0x5   :  { %2510 = vmatprep.subr.mxu0 %v3860_v3  ;;  %v3126_v20 = vsub.f32 %v31_v7, %v3093_v10  ;;  %v3129_v21 = vsub.f32 %v30_v8, %v3095_v11  ;;  %v3141_v25 = vand.u32 4294901760, %v27_v14  ;;  %v3150_v28 = vand.u32 4294901760, %v26_v19 }
   0x6   :  { %2511 = vmatpush3.msra.mxu0 %v3079_v5  ;;  %v3133_v22 = vand.u32 4294901760, %v3111_v15  ;;  %v3136_v23 = vand.u32 4294901760, %v3114_v16  ;;  %v3139_v24 = vand.u32 4294901760, %v3119_v18  ;;  %v3156_v30 = vsub.f32 %v29_v9, %v3097_v12 }
   0x7   :  { %2512 = vmatprep.subr.mxu0 %v3860_v3  ;;  %v3148_v27 = vand.u32 4294901760, %v3126_v20  ;;  %v3153_v29 = vand.u32 4294901760, %v3129_v21  ;;  %v3166_v34 = vsub.f32 %v28_v13, %v3116_v17 }
   0x8   :  { %3863 = vst [vmem:[#allocation5_spill] sm:$0xff] %v3133_v22  ;;  %3864 = vst [vmem:[#allocation6_spill] sm:$0xff] %v3136_v23  ;;  %2513 = vmatpush3.msra.mxu0 %v3081_v6  ;;  %v130_v31 = vsub.f32 %v3111_v15, %v3133_v22  ;;  %v137_v32 = vsub.f32 %v3114_v16, %v3136_v23  ;;  %v144_v33 = vsub.f32 %v3119_v18, %v3139_v24 }
   0x9   :  { %3865 = vst [vmem:[#allocation7_spill] sm:$0xff] %v3139_v24  ;;  %3866 = vst [vmem:[#allocation8_spill] sm:$0xff] %v3148_v27 }
   0xa   :  { %3867 = vst [vmem:[#allocation9_spill] sm:$0xff] %v3153_v29 }
   0xb   :  { %9 = vsyncpa [#allocation3], 0  ;;  %2514 = vmatprep.subr.mxu0 %v3860_v3  ;;  %v3169_v35 = vand.u32 4294901760, %v25_v26  ;;  %v24_v36 = vld [vmem:[%s3830_s1 + $0x28] sm:$0xff]  ;;  %v3175_v37 = vand.u32 4294901760, %v130_v31  ;;  %v3177_v38 = vand.u32 4294901760, %v137_v32  ;;  %v151_v39 = vsub.f32 %v3126_v20, %v3148_v27 }
   0xc   :  { %2515 = vmatpush3.msra.mxu0 %v3093_v10  ;;  %v3182_v40 = vand.u32 4294901760, %v3156_v30  ;;  %v23_v41 = vld [vmem:[%s3830_s1 + $0x20] sm:$0xff]  ;;  %v158_v42 = vsub.f32 %v3129_v21, %v3153_v29  ;;  %v3191_v43 = vsub.f32 %v27_v14, %v3141_v25  ;;  %v3195_v44 = vand.u32 4294901760, %v144_v33  ;;  %v22_v49 = vld [vmem:[%s3830_s1 + $0x18] sm:$0xff]  ;;  %v21_v54 = vld [vmem:[%s3830_s1 + $0x10] sm:$0xff] }
   0xd   :  { %2516 = vmatprep.subr.mxu0 %v3860_v3  ;;  %2544 = vmatpush3.msra.mxu1 %v3175_v37  ;;  %v3197_v45 = vand.u32 4294901760, %v24_v36  ;;  %v3200_v46 = vand.u32 4294901760, %v3166_v34  ;;  %v3203_v47 = vsub.f32 %v26_v19, %v3150_v28  ;;  %v3207_v48 = vand.u32 4294901760, %v23_v41  ;;  %v3215_v50 = vld [vmem:[%s3829_s0] sm:$0xf]  ;;  %v20_v60 = vld [vmem:[%s3830_s1 + $0x8] sm:$0xff] }
   0xe   :  { %3868 = vst [vmem:[#allocation10_spill] sm:$0xff] %v3182_v40  ;;  %2517 = vmatpush3.msra.mxu0 %v3095_v11  ;;  %2545 = vmatprep.subr.mxu1 %v3860_v3  ;;  %3870 = vst [vmem:[#allocation12_spill] sm:$0xff] %v3215_v50  ;;  %v3219_v51 = vand.u32 4294901760, %v151_v39  ;;  %v165_v52 = vsub.f32 %v3156_v30, %v3182_v40  ;;  %v3224_v53 = vand.u32 4294901760, %v3191_v43  ;;  %v3234_v56 = vand.u32 4294901760, %v158_v42  ;;  %v19_v7 = vld [vmem:[%s3830_s1] sm:$0xff] }
   0xf   :  { %3869 = vst [vmem:[#allocation11_spill] sm:$0xff] %v3200_v46  ;;  %2518 = vmatprep.subr.mxu0 %v3860_v3  ;;  %2546 = vmatpush3.msra.mxu1 %v3177_v38  ;;  %v3230_v55 = vsub.f32 %v25_v26, %v3169_v35  ;;  %v3237_v57 = vand.u32 4294901760, %v3203_v47  ;;  %v172_v58 = vsub.f32 %v3166_v34, %v3200_v46  ;;  %v3243_v59 = vand.u32 4294901760, %v22_v49 }
  0x10   :  { %2519 = vmatpush3.msra.mxu0 %v3097_v12  ;;  %3871 = vst [vmem:[#allocation13_spill] sm:$0xff] %v3219_v51  ;;  %3872 = vst [vmem:[#allocation14_spill] sm:$0xff] %v3224_v53  ;;  %2547 = vmatprep.subr.mxu1 %v3860_v3  ;;  %v3249_v61 = vsub.f32 %v24_v36, %v3197_v45  ;;  %v3252_v62 = vand.u32 4294901760, %v3215_v50  ;;  %v3256_v63 = vand.u32 4294901760, %v21_v54  ;;  %v3260_v0 = vand.u32 4294901760, %v165_v52 }
  0x11   :  { %2520 = vmatprep.subr.mxu0 %v3860_v3  ;;  %3873 = vst [vmem:[#allocation15_spill] sm:$0xff] %v3234_v56  ;;  %3874 = vst [vmem:[#allocation16_spill] sm:$0xff] %v3237_v57  ;;  %2548 = vmatpush3.msra.mxu1 %v3195_v44  ;;  %v179_v1 = vsub.f32 %v3191_v43, %v3224_v53  ;;  %v3265_v2 = vand.u32 4294901760, %v3230_v55  ;;  %v3271_v8 = vsub.f32 %v23_v41, %v3207_v48  ;;  %vm679_vm1 = vcmask 130048  }
  0x12   :  { %2521 = vmatpush3.msra.mxu0 %v3116_v17  ;;  %2549 = vmatprep.subr.mxu1 %v3860_v3  ;;  %3875 = vst [vmem:[#allocation17_spill] sm:$0xff] %v3260_v0  ;;  %v186_v9 = vsub.f32 %v3203_v47, %v3237_v57  ;;  %v3277_v13 = vand.u32 4294901760, %v20_v60  ;;  %v3281_v14 = vand.u32 4294901760, %v172_v58  ;;  %v3284_v19 = vand.u32 4294901760, %v3249_v61 }
  0x13   :  { %2522 = vmatprep.subr.mxu0 %v3860_v3  ;;  %2550 = vmatpush3.msra.mxu1 %v3219_v51  ;;  %3876 = vst [vmem:[#allocation18_spill] sm:$0xff] %v3265_v2  ;;  %v3288_v26 = vsub.f32 %v3215_v50, %v3252_v62  ;;  %v3291_v31 = vsub.f32 %v22_v49, %v3243_v59  ;;  %v3295_v32 = vand.u32 4294901760, %v19_v7  ;;  %v3299_v33 = vand.u32 4294901760, %v179_v1 }
  0x14   :  { %2523 = vmatpush3.msra.mxu0 %v3141_v25  ;;  %2551 = vmatprep.subr.mxu1 %v3860_v3  ;;  %3877 = vst [vmem:[#allocation19_spill] sm:$0xff] %v3281_v14  ;;  %3878 = vst [vmem:[#allocation20_spill] sm:$0xff] %v3284_v19  ;;  %v193_v36 = vsub.f32 %v3230_v55, %v3265_v2  ;;  %v3304_v39 = vand.u32 4294901760, %v3271_v8  ;;  %v3307_v41 = vsub.f32 %v21_v54, %v3256_v63 }
  0x15   :  { %2524 = vmatprep.subr.mxu0 %v3860_v3  ;;  %2552 = vmatpush3.msra.mxu1 %v3234_v56  ;;  %3879 = vst [vmem:[#allocation21_spill] sm:$0xff] %v3299_v33  ;;  %v3311_v42 = vand.u32 4294901760, %v186_v9  ;;  %v200_v49 = vsub.f32 %v3249_v61, %v3284_v19  ;;  %v3319_v58 = vand.u32 4294901760, %v3291_v31  ;;  %v3322_v54 = vsub.f32 %v20_v60, %v3277_v13 }
  0x16   :  { %2525 = vmatpush3.msra.mxu0 %v3150_v28  ;;  %2553 = vmatprep.subr.mxu1 %v3860_v3  ;;  %3880 = vst [vmem:[#allocation22_spill] sm:$0xff] %v3304_v39  ;;  %3881 = vst [vmem:[#allocation23_spill] sm:$0xff] %v3307_v41  ;;  %v3328_v1 = vand.u32 4294901760, %v193_v36  ;;  %v207_v9 = vsub.f32 %v3271_v8, %v3304_v39  ;;  %v3333_v52 = vand.u32 4294901760, %v3307_v41  ;;  %v3888_v36 = vand.u32 4294901760, %v3288_v26 }
  0x17   :  { %2526 = vmatprep.subr.mxu0 %v3860_v3  ;;  %2554 = vmatpush3.msra.mxu1 %v3260_v0  ;;  %3882 = vst [vmem:[#allocation24_spill] sm:$0xff] %v3311_v42  ;;  %3883 = vst [vmem:[#allocation25_spill] sm:$0xff] %v3319_v58  ;;  %v3336_v50 = vsub.f32 %v19_v7, %v3295_v32  ;;  %v3342_v60 = vand.u32 4294901760, %v200_v49  ;;  %v3350_v7 = vand.u32 4294901760, %v3322_v54 }
  0x18   :  { %2527 = vmatpush3.msra.mxu0 %v3169_v35  ;;  %2555 = vmatprep.subr.mxu1 %v3860_v3  ;;  %3884 = vst [vmem:[#allocation26_spill] sm:$0xff] %v3322_v54  ;;  %3885 = vst [vmem:[#allocation27_spill] sm:$0xff] %v3328_v1  ;;  %v3356_v49 = vand.u32 4294901760, %v207_v9 }
  0x19   :  { %2528 = vmatprep.subr.mxu0 %v3860_v3  ;;  %2556 = vmatpush3.msra.mxu1 %v3281_v14  ;;  %3886 = vst [vmem:[#allocation28_spill] sm:$0xff] %v3333_v52  ;;  %3887 = vst [vmem:[#allocation29_spill] sm:$0xff] %v3336_v50  ;;  %v214_v14 = vsub.f32 %v3291_v31, %v3319_v58  ;;  %v228_v9 = vsub.f32 %v3322_v54, %v3350_v7 }
  0x1a   :  { %2529 = vmatpush3.msra.mxu0 %v3197_v45  ;;  %2557 = vmatprep.subr.mxu1 %v3860_v3  ;;  %3889 = vst [vmem:[#allocation30_spill] sm:$0xff] %v3350_v7 }
  0x1b   :  { %2530 = vmatprep.subr.mxu0 %v3860_v3  ;;  %2558 = vmatpush3.msra.mxu1 %v3299_v33  ;;  %v119_v33 = vsub.f32 %v3288_v26, %v3888_v36  ;;  %v3361_v36 = vand.u32 4294901760, %v3336_v50  ;;  %v3367_v56 = vand.u32 4294901760, %v214_v14  ;;  %v3382_v14 = vand.u32 4294901760, %v228_v9 }
  0x1c   :  { %2531 = vmatpush3.msra.mxu0 %v3207_v48  ;;  %2559 = vmatprep.subr.mxu1 %v3860_v3 }
  0x1d   :  { %2532 = vmatprep.subr.mxu0 %v3860_v3  ;;  %2560 = vmatpush3.msra.mxu1 %v3311_v42  ;;  %v221_v42 = vsub.f32 %v3307_v41, %v3333_v52  ;;  %3890 = vst [vmem:[#allocation31_spill] sm:$0xff] %v3361_v36  ;;  %v120_v0 = vand.u32 4294901760, %v119_v33  ;;  %v235_v51 = vsub.f32 %v3336_v50, %v3361_v36 }
  0x1e   :  { %2533 = vmatpush3.msra.mxu0 %v3243_v59  ;;  %2561 = vmatprep.subr.mxu1 %v3860_v3 }
  0x1f   :  { %2534 = vmatprep.subr.mxu0 %v3860_v3  ;;  %2562 = vmatpush3.msra.mxu1 %v3328_v1  ;;  %v3375_v1 = vand.u32 4294901760, %v221_v42  ;;  %v3388_v33 = vand.u32 4294901760, %v235_v51  ;;  %v3891_v51 = vand.u32 4294901760, %v3288_v26  ;;  %v677_v42 = vld [vmem:[%s3831_s2] sm:$0xff] }
  0x20   :  { %2535 = vmatpush3.msra.mxu0 %v3256_v63  ;;  %2563 = vmatprep.subr.mxu1 %v3860_v3 }
  0x21   :  { %2536 = vmatprep.subr.mxu0 %v3860_v3  ;;  %2564 = vmatpush3.msra.mxu1 %v3342_v60 }
  0x22   :  { %2537 = vmatpush3.msra.mxu0 %v3277_v13  ;;  %2565 = vmatprep.subr.mxu1 %v3860_v3 }
  0x23   :  { %2538 = vmatprep.subr.mxu0 %v3860_v3  ;;  %2566 = vmatpush3.msra.mxu1 %v3356_v49 }
  0x24   :  { %2539 = vmatpush3.msra.mxu0 %v3295_v32  ;;  %2567 = vmatprep.subr.mxu1 %v3860_v3 }
  0x25   :  { %2578 = vmatprep.subr.mxu0 %v3860_v3  ;;  %2541 = vmatmul.mubr.f32.vlgmr.msra.gmra.mxu0 %v120_v0  ;;  %v678_v0 = vld [vmem:[%s3831_s2 + $0x8] sm:$0xff] }
  0x26   :  { %2568 = vmatpush3.msra.mxu1 %v3367_v56  ;;  %2579 = vmatpush3.msra.mxu0 %v3111_v15 }
  0x27   :  { %2569 = vmatprep.subr.mxu1 %v3860_v3  ;;  %2580 = vmatprep.subr.mxu0 %v3860_v3 }
  0x28   :  { %2570 = vmatpush3.msra.mxu1 %v3375_v1  ;;  %2581 = vmatpush3.msra.mxu0 %v3114_v16 }
  0x29   :  { %2571 = vmatprep.subr.mxu1 %v3860_v3  ;;  %2582 = vmatprep.subr.mxu0 %v3860_v3 }
  0x2a   :  { %2572 = vmatpush3.msra.mxu1 %v3382_v14  ;;  %2583 = vmatpush3.msra.mxu0 %v3119_v18 }
  0x2b   :  { %2573 = vmatprep.subr.mxu1 %v3860_v3  ;;  %2584 = vmatprep.subr.mxu0 %v3860_v3 }
  0x2c   :  { %2574 = vmatpush3.msra.mxu1 %v3388_v33  ;;  %2585 = vmatpush3.msra.mxu0 %v3126_v20 }
  0x2d   :  { %2576 = vmatmul.mubr.f32.vlgmr.msra.gmra.mxu1 %v3252_v62  ;;  %2586 = vmatprep.subr.mxu0 %v3860_v3 }
  0x2e   :  { %2613 = vmatprep.subr.mxu1 %v3860_v3  ;;  %2587 = vmatpush3.msra.mxu0 %v3129_v21 }
  0x2f   :  { %2614 = vmatpush3.msra.mxu1 %v3077_v4  ;;  %2588 = vmatprep.subr.mxu0 %v3860_v3 }
  0x30   :  { %2615 = vmatprep.subr.mxu1 %v3860_v3  ;;  %2589 = vmatpush3.msra.mxu0 %v3156_v30 }
  0x31   :  { %2616 = vmatpush3.msra.mxu1 %v3079_v5  ;;  %2590 = vmatprep.subr.mxu0 %v3860_v3 }
  0x32   :  { %2617 = vmatprep.subr.mxu1 %v3860_v3  ;;  %2591 = vmatpush3.msra.mxu0 %v3166_v34 }
  0x33   :  { %2618 = vmatpush3.msra.mxu1 %v3081_v6  ;;  %2592 = vmatprep.subr.mxu0 %v3860_v3 }
  0x34   :  { %2619 = vmatprep.subr.mxu1 %v3860_v3  ;;  %2593 = vmatpush3.msra.mxu0 %v3191_v43 }
  0x35   :  { %2620 = vmatpush3.msra.mxu1 %v3093_v10  ;;  %2594 = vmatprep.subr.mxu0 %v3860_v3 }
  0x36   :  { %2621 = vmatprep.subr.mxu1 %v3860_v3  ;;  %2595 = vmatpush3.msra.mxu0 %v3203_v47 }
  0x37   :  { %2622 = vmatpush3.msra.mxu1 %v3095_v11  ;;  %2596 = vmatprep.subr.mxu0 %v3860_v3 }
  0x38   :  { %2623 = vmatprep.subr.mxu1 %v3860_v3  ;;  %2597 = vmatpush3.msra.mxu0 %v3230_v55 }
  0x39   :  { %2624 = vmatpush3.msra.mxu1 %v3097_v12  ;;  %2598 = vmatprep.subr.mxu0 %v3860_v3 }
  0x3a   :  { %2625 = vmatprep.subr.mxu1 %v3860_v3  ;;  %2599 = vmatpush3.msra.mxu0 %v3249_v61 }
  0x3b   :  { %2626 = vmatpush3.msra.mxu1 %v3116_v17  ;;  %2600 = vmatprep.subr.mxu0 %v3860_v3 }
  0x3c   :  { %2627 = vmatprep.subr.mxu1 %v3860_v3  ;;  %2601 = vmatpush3.msra.mxu0 %v3271_v8 }
  0x3d   :  { %2628 = vmatpush3.msra.mxu1 %v3141_v25  ;;  %2602 = vmatprep.subr.mxu0 %v3860_v3 }
  0x3e   :  { %2629 = vmatprep.subr.mxu1 %v3860_v3  ;;  %2603 = vmatpush3.msra.mxu0 %v3291_v31 }
  0x3f   :  { %2630 = vmatpush3.msra.mxu1 %v3150_v28  ;;  %2604 = vmatprep.subr.mxu0 %v3860_v3 }
  0x40   :  { %2631 = vmatprep.subr.mxu1 %v3860_v3  ;;  %2605 = vmatpush3.msra.mxu0 %v3307_v41 }
  0x41   :  { %2632 = vmatpush3.msra.mxu1 %v3169_v35  ;;  %2606 = vmatprep.subr.mxu0 %v3860_v3 }
  0x42   :  { %2633 = vmatprep.subr.mxu1 %v3860_v3  ;;  %2607 = vmatpush3.msra.mxu0 %v3322_v54 }
  0x43   :  { %2634 = vmatpush3.msra.mxu1 %v3197_v45  ;;  %2608 = vmatprep.subr.mxu0 %v3860_v3 }
  0x44   :  { %2635 = vmatprep.subr.mxu1 %v3860_v3  ;;  %2609 = vmatpush3.msra.mxu0 %v3336_v50 }
  0x45   :  { %2610 = vmatprep.mubr.msk.f32.mxu0 %vm3040_vm0, %v3860_v3  ;;  %2636 = vmatpush3.msra.mxu1 %v3207_v48 }
  0x46   :  { %2611 = vmatmul.mubr.f32.vlgmr.msra.gmra.mxu0 %v3288_v26  ;;  %2637 = vmatprep.subr.mxu1 %v3860_v3  ;;  %v712_v26 = vand.u32 4294901760, %v678_v0 }
  0x47   :  { %2648 = vmatprep.subr.mxu0 %v3860_v3  ;;  %2638 = vmatpush3.msra.mxu1 %v3243_v59 }
  0x48   :  { %2649 = vmatpush3.msra.mxu0 %v3133_v22  ;;  %2639 = vmatprep.subr.mxu1 %v3860_v3  ;;  %v3545_v9 = vsub.f32 %v678_v0, %v712_v26 }
  0x49   :  { %2650 = vmatprep.subr.mxu0 %v3860_v3  ;;  %2640 = vmatpush3.msra.mxu1 %v3256_v63 }
  0x4a   :  { %2651 = vmatpush3.msra.mxu0 %v3136_v23  ;;  %2641 = vmatprep.subr.mxu1 %v3860_v3 }
  0x4b   :  { %2652 = vmatprep.subr.mxu0 %v3860_v3  ;;  %2642 = vmatpush3.msra.mxu1 %v3277_v13 }
  0x4c   :  { %2653 = vmatpush3.msra.mxu0 %v3139_v24  ;;  %2643 = vmatprep.subr.mxu1 %v3860_v3 }
  0x4d   :  { %2654 = vmatprep.subr.mxu0 %v3860_v3  ;;  %2644 = vmatpush3.msra.mxu1 %v3295_v32 }
  0x4e   :  { %2645 = vmatprep.mubr.msk.f32.mxu1 %vm3040_vm0, %v3860_v3  ;;  %2655 = vmatpush3.msra.mxu0 %v3148_v27 }
  0x4f   :  { %2646 = vmatmul.mubr.f32.vlgmr.msra.gmra.mxu1 %v3891_v51  ;;  %2656 = vmatprep.subr.mxu0 %v3860_v3  ;;  %v715_v51 = vand.u32 4294901760, %v677_v42 }
  0x50   :  { %2683 = vmatprep.subr.mxu1 %v3860_v3  ;;  %2657 = vmatpush3.msra.mxu0 %v3153_v29 }
  0x51   :  { %2684 = vmatpush3.msra.mxu1 %v3077_v4  ;;  %2658 = vmatprep.subr.mxu0 %v3860_v3 }
  0x52   :  { %2685 = vmatprep.subr.mxu1 %v3860_v3  ;;  %2659 = vmatpush3.msra.mxu0 %v3182_v40 }
  0x53   :  { %2686 = vmatpush3.msra.mxu1 %v3079_v5  ;;  %2660 = vmatprep.subr.mxu0 %v3860_v3 }
  0x54   :  { %2687 = vmatprep.subr.mxu1 %v3860_v3  ;;  %2661 = vmatpush3.msra.mxu0 %v3200_v46 }
  0x55   :  { %2688 = vmatpush3.msra.mxu1 %v3081_v6  ;;  %2662 = vmatprep.subr.mxu0 %v3860_v3 }
  0x56   :  { %2689 = vmatprep.subr.mxu1 %v3860_v3  ;;  %2663 = vmatpush3.msra.mxu0 %v3224_v53 }
  0x57   :  { %2690 = vmatpush3.msra.mxu1 %v3093_v10  ;;  %2664 = vmatprep.subr.mxu0 %v3860_v3 }
  0x58   :  { %2691 = vmatprep.subr.mxu1 %v3860_v3  ;;  %2665 = vmatpush3.msra.mxu0 %v3237_v57 }
  0x59   :  { %2692 = vmatpush3.msra.mxu1 %v3095_v11  ;;  %2666 = vmatprep.subr.mxu0 %v3860_v3 }
  0x5a   :  { %2693 = vmatprep.subr.mxu1 %v3860_v3  ;;  %2667 = vmatpush3.msra.mxu0 %v3265_v2 }
  0x5b   :  { %2694 = vmatpush3.msra.mxu1 %v3097_v12  ;;  %2668 = vmatprep.subr.mxu0 %v3860_v3 }
  0x5c   :  { %2695 = vmatprep.subr.mxu1 %v3860_v3  ;;  %2669 = vmatpush3.msra.mxu0 %v3284_v19 }
  0x5d   :  { %2696 = vmatpush3.msra.mxu1 %v3116_v17  ;;  %2670 = vmatprep.subr.mxu0 %v3860_v3 }
  0x5e   :  { %2697 = vmatprep.subr.mxu1 %v3860_v3  ;;  %2671 = vmatpush3.msra.mxu0 %v3304_v39 }
  0x5f   :  { %2698 = vmatpush3.msra.mxu1 %v3141_v25  ;;  %2672 = vmatprep.subr.mxu0 %v3860_v3 }
  0x60   :  { %2699 = vmatprep.subr.mxu1 %v3860_v3  ;;  %2673 = vmatpush3.msra.mxu0 %v3319_v58 }
  0x61   :  { %2700 = vmatpush3.msra.mxu1 %v3150_v28  ;;  %2674 = vmatprep.subr.mxu0 %v3860_v3 }
  0x62   :  { %2701 = vmatprep.subr.mxu1 %v3860_v3  ;;  %2675 = vmatpush3.msra.mxu0 %v3333_v52 }
  0x63   :  { %2702 = vmatpush3.msra.mxu1 %v3169_v35  ;;  %2676 = vmatprep.subr.mxu0 %v3860_v3 }
  0x64   :  { %2703 = vmatprep.subr.mxu1 %v3860_v3  ;;  %2677 = vmatpush3.msra.mxu0 %v3350_v7 }
  0x65   :  { %2704 = vmatpush3.msra.mxu1 %v3197_v45  ;;  %2678 = vmatprep.subr.mxu0 %v3860_v3 }
  0x66   :  { %2705 = vmatprep.subr.mxu1 %v3860_v3  ;;  %2679 = vmatpush3.msra.mxu0 %v3361_v36  ;;  %v797_v36 = vsub.f32 %v677_v42, %v715_v51 }
  0x67   :  { %2680 = vmatprep.mubr.msk.f32.mxu0 %vm3040_vm0, %v3860_v3  ;;  %2706 = vmatpush3.msra.mxu1 %v3207_v48 }
  0x68   :  { %2681 = vmatmul.mubr.f32.vlgmr.msra.gmra.mxu0 %v3252_v62  ;;  %2707 = vmatprep.subr.mxu1 %v3860_v3  ;;  %v798_v52 = vand.u32 4294901760, %v797_v36 }
  0x69   :  { %2715 = vmatprep.mubr.msk.f32.mxu1 %vm3040_vm0, %v3860_v3  ;;  %2708 = vmatpush3.msra.mxu1 %v3243_v59 }
  0x6a   :  { %2718 = vmatprep.subr.mxu0 %v3860_v3  ;;  %2709 = vmatprep.subr.mxu1 %v3860_v3  ;;  %v799_v39 = vsub.f32 %v797_v36, %v798_v52 }
  0x6b   :  { %2722 = vmatprep.mubr.msk.f32.mxu0 %vm3040_vm0, %v3860_v3  ;;  %2710 = vmatpush3.msra.mxu1 %v3256_v63 }
  0x6c   :  { %2711 = vmatprep.subr.mxu1 %v3860_v3  ;;  %2719 = vmatpush3.msra.mxu0 %v712_v26  ;;  %v800_v19 = vand.u32 4294901760, %v799_v39 }
  0x6d   :  { %2712 = vmatpush3.msra.mxu1 %v3277_v13  ;;  %2720 = vmatprep.subr.mxu0 %v3860_v3 }
  0x6e   :  { %2713 = vmatprep.subr.mxu1 %v3860_v3  ;;  %2721 = vmatpush3.msra.mxu0 %v715_v51 }
  0x6f   :  { %2714 = vmatpush3.msra.mxu1 %v3295_v32  ;;  %2732 = vmatprep.subr.mxu0 %v3860_v3 }
  0x70   :  { %2716 = vmatmul.mubr.f32.vlgmr.msra.gmra.mxu1 %v3252_v62  ;;  %2725 = vmatprep.subr.mxu1 %v3860_v3  ;;  %v791_v62 = vand.u32 4294901760, %v3545_v9 }
  0x71   :  { %2729 = vmatprep.mubr.msk.f32.mxu1 %vm3040_vm0, %v3860_v3 }
  0x72   :  { %v792_v7 = vsub.f32 %v3545_v9, %v791_v62 }
  0x74   :  { %v793_v58 = vand.u32 4294901760, %v792_v7 }
  0x76   :  { %2726 = vmatpush3.msra.mxu1 %v793_v58 }
  0x77   :  { %2727 = vmatprep.subr.mxu1 %v3860_v3 }
  0x78   :  { %2728 = vmatpush3.msra.mxu1 %v800_v19 }
  0x79   :  { %2739 = vmatprep.subr.mxu1 %v3860_v3 }
  0xe5   :  { %v122_v0 = vpop.f32.mrf.mxu0 }
  0xe7   :  { %v2542_v2 = vpop.f32.mrf.mxu0 }
  0xed   :  { %v273_v57 = vpop.f32.mrf.mxu1 }
  0xee   :  { %v274_v24 = vadd.f32 %v273_v57, %v122_v0  ;;  %v3900_v0 = vld [vmem:[#allocation12_spill] sm:$0xff] }
  0xef   :  { %v2577_v53 = vpop.f32.mrf.mxu1 }
 0x106   :  { %v377_v42 = vpop.f32.mrf.mxu0 }
 0x107   :  { %v378_v7 = vadd.f32 %v377_v42, %v274_v24  ;;  %v3893_v24 = vld [vmem:[#allocation13_spill] sm:$0xff] }
 0x108   :  { %v2612_v46 = vpop.f32.mrf.mxu0 }
 0x109   :  { %v3892_v46 = vmov 0.0  }
 0x10f   :  { %v466_v40 = vpop.f32.mrf.mxu1 }
 0x110   :  { %v467_v22 = vadd.f32 %v466_v40, %v378_v7  ;;  %v3898_v40 = vld [vmem:[#allocation24_spill] sm:$0xff] }
 0x111   :  { %v2647_v29 = vpop.f32.mrf.mxu1 }
 0x112   :  { %v3895_v29 = vld [vmem:[#allocation17_spill] sm:$0xff] }
 0x128   :  { %v585_v27 = vpop.f32.mrf.mxu0 }
 0x129   :  { %v586_v58 = vadd.f32 %v585_v27, %v467_v22  ;;  %v3894_v27 = vld [vmem:[#allocation15_spill] sm:$0xff] }
 0x12a   :  { %v2682_v23 = vpop.f32.mrf.mxu0 }
 0x130   :  { %v672_v39 = vpop.f32.mrf.mxu1 }
 0x131   :  { %v673_v50 = vadd.f32 %v672_v39, %v586_v58 }
 0x132   :  { %v2717_v19 = vpop.f32.mrf.mxu1 }
 0x133   :  { %v676_v54 = vmul.f32 0.125, %v673_v50 }
 0x135   :  { %v681_v3 = vsel %vm679_vm1, %v676_v54, 0 }
 0x136   :  { %v750_v2 = vand.u32 4294901760, %v681_v3 }
 0x138   :  { %v751_v41 = vsub.f32 %v681_v3, %v750_v2  ;;  %2730 = vmatmul.mubr.f32.vlgmr.msra.gmra.mxu1 %v750_v2 }
 0x139   :  { %2740 = vmatpush3.msra.mxu1 %v712_v26  ;;  %2743 = vmatprep.mubr.msk.f32.mxu1 %vm3040_vm0, %v3892_v46 }
 0x13a   :  { %2741 = vmatprep.subr.mxu1 %v3892_v46  ;;  %v752_v23 = vand.u32 4294901760, %v751_v41 }
 0x13b   :  { %2742 = vmatpush3.msra.mxu1 %v715_v51 }
 0x13c   :  { %2744 = vmatmul.mubr.f32.vlgmr.msra.gmra.mxu1 %v752_v23  ;;  %2753 = vmatprep.subr.mxu1 %v3892_v46  ;;  %v753_v22 = vsub.f32 %v751_v41, %v752_v23 }
 0x13d   :  { %2754 = vmatpush3.msra.mxu1 %v712_v26  ;;  %2757 = vmatprep.mubr.msk.f32.mxu1 %vm3040_vm0, %v3892_v46 }
 0x13e   :  { %2755 = vmatprep.subr.mxu1 %v3892_v46  ;;  %v754_v3 = vand.u32 4294901760, %v753_v22 }
 0x13f   :  { %2756 = vmatpush3.msra.mxu1 %v715_v51 }
 0x140   :  { %2723 = vmatmul.mubr.f32.vlgmr.msra.gmra.mxu0 %v754_v3  ;;  %2758 = vmatmul.mubr.f32.vlgmr.msra.gmra.mxu1 %v750_v2 }
 0x141   :  { %2733 = vmatpush3.msra.mxu0 %v3545_v9  ;;  %2736 = vmatprep.mubr.msk.f32.mxu0 %vm3040_vm0, %v3892_v46 }
 0x142   :  { %2734 = vmatprep.subr.mxu0 %v3892_v46  ;;  %2795 = vmatprep.subr.mxu1 %v3892_v46 }
 0x143   :  { %2735 = vmatpush3.msra.mxu0 %v797_v36  ;;  %2796 = vmatpush3.msra.mxu1 %v3175_v37  ;;  %v3896_v37 = vld [vmem:[#allocation19_spill] sm:$0xff] }
 0x144   :  { %2746 = vmatprep.subr.mxu0 %v3892_v46  ;;  %2737 = vmatmul.mubr.f32.vlgmr.msra.gmra.mxu0 %v751_v41 }
 0x145   :  { %2747 = vmatpush3.msra.mxu0 %v791_v62  ;;  %2750 = vmatprep.mubr.msk.f32.mxu0 %vm3040_vm0, %v3892_v46 }
 0x146   :  { %2748 = vmatprep.subr.mxu0 %v3892_v46  ;;  %2797 = vmatprep.subr.mxu1 %v3892_v46 }
 0x147   :  { %2749 = vmatpush3.msra.mxu0 %v798_v52  ;;  %2798 = vmatpush3.msra.mxu1 %v3177_v38  ;;  %v3897_v38 = vld [vmem:[#allocation21_spill] sm:$0xff] }
 0x148   :  { %2751 = vmatmul.mubr.f32.vlgmr.msra.gmra.mxu0 %v750_v2  ;;  %2799 = vmatprep.subr.mxu1 %v3892_v46 }
 0x149   :  { %2800 = vmatpush3.msra.mxu1 %v3195_v44  ;;  %2760 = vmatprep.subr.mxu0 %v3892_v46  ;;  %v3899_v44 = vld [vmem:[#allocation27_spill] sm:$0xff] }
 0x14a   :  { %2801 = vmatprep.subr.mxu1 %v3892_v46  ;;  %2761 = vmatpush3.msra.mxu0 %v3077_v4 }
 0x14b   :  { %2802 = vmatpush3.msra.mxu1 %v3893_v24  ;;  %2762 = vmatprep.subr.mxu0 %v3892_v46 }
 0x14c   :  { %2803 = vmatprep.subr.mxu1 %v3892_v46  ;;  %2763 = vmatpush3.msra.mxu0 %v3079_v5 }
 0x14d   :  { %2804 = vmatpush3.msra.mxu1 %v3894_v27  ;;  %2764 = vmatprep.subr.mxu0 %v3892_v46 }
 0x14e   :  { %2805 = vmatprep.subr.mxu1 %v3892_v46  ;;  %2765 = vmatpush3.msra.mxu0 %v3081_v6 }
 0x14f   :  { %2806 = vmatpush3.msra.mxu1 %v3895_v29  ;;  %2766 = vmatprep.subr.mxu0 %v3892_v46 }
 0x150   :  { %2807 = vmatprep.subr.mxu1 %v3892_v46  ;;  %2767 = vmatpush3.msra.mxu0 %v3093_v10 }
 0x151   :  { %2808 = vmatpush3.msra.mxu1 %v3896_v37  ;;  %2768 = vmatprep.subr.mxu0 %v3892_v46 }
 0x152   :  { %2809 = vmatprep.subr.mxu1 %v3892_v46  ;;  %2769 = vmatpush3.msra.mxu0 %v3095_v11 }
 0x153   :  { %2810 = vmatpush3.msra.mxu1 %v3897_v38  ;;  %2770 = vmatprep.subr.mxu0 %v3892_v46 }
 0x154   :  { %2811 = vmatprep.subr.mxu1 %v3892_v46  ;;  %2771 = vmatpush3.msra.mxu0 %v3097_v12 }
 0x155   :  { %2812 = vmatpush3.msra.mxu1 %v3898_v40  ;;  %2772 = vmatprep.subr.mxu0 %v3892_v46 }
 0x156   :  { %2813 = vmatprep.subr.mxu1 %v3892_v46  ;;  %2773 = vmatpush3.msra.mxu0 %v3116_v17 }
 0x157   :  { %2814 = vmatpush3.msra.mxu1 %v3899_v44  ;;  %2774 = vmatprep.subr.mxu0 %v3892_v46 }
 0x158   :  { %2815 = vmatprep.subr.mxu1 %v3892_v46  ;;  %2775 = vmatpush3.msra.mxu0 %v3141_v25 }
 0x159   :  { %2816 = vmatpush3.msra.mxu1 %v3342_v60  ;;  %2776 = vmatprep.subr.mxu0 %v3892_v46 }
 0x15a   :  { %2817 = vmatprep.subr.mxu1 %v3892_v46  ;;  %2777 = vmatpush3.msra.mxu0 %v3150_v28 }
 0x15b   :  { %2818 = vmatpush3.msra.mxu1 %v3356_v49  ;;  %2778 = vmatprep.subr.mxu0 %v3892_v46 }
 0x15c   :  { %2819 = vmatprep.subr.mxu1 %v3892_v46  ;;  %2779 = vmatpush3.msra.mxu0 %v3169_v35 }
 0x15d   :  { %2820 = vmatpush3.msra.mxu1 %v3367_v56  ;;  %2780 = vmatprep.subr.mxu0 %v3892_v46 }
 0x15e   :  { %2821 = vmatprep.subr.mxu1 %v3892_v46  ;;  %2781 = vmatpush3.msra.mxu0 %v3197_v45 }
 0x15f   :  { %2822 = vmatpush3.msra.mxu1 %v3375_v1  ;;  %2782 = vmatprep.subr.mxu0 %v3892_v46 }
 0x160   :  { %2823 = vmatprep.subr.mxu1 %v3892_v46  ;;  %2783 = vmatpush3.msra.mxu0 %v3207_v48 }
 0x161   :  { %2824 = vmatpush3.msra.mxu1 %v3382_v14  ;;  %2784 = vmatprep.subr.mxu0 %v3892_v46 }
 0x162   :  { %2825 = vmatprep.subr.mxu1 %v3892_v46  ;;  %2827 = vmatprep.mubr.msk.f32.mxu1 %vm3040_vm0, %v3892_v46 }
 0x163   :  { %2826 = vmatpush3.msra.mxu1 %v3388_v33  ;;  %2785 = vmatpush3.msra.mxu0 %v3243_v59 }
 0x164   :  { %2865 = vmatprep.subr.mxu1 %v3892_v46  ;;  %2786 = vmatprep.subr.mxu0 %v3892_v46 }
 0x165   :  { %2787 = vmatpush3.msra.mxu0 %v3256_v63  ;;  %2792 = vmatprep.mubr.msk.f32.mxu0 %vm3040_vm0, %v3892_v46 }
 0x166   :  { %2788 = vmatprep.subr.mxu0 %v3892_v46 }
 0x167   :  { %2789 = vmatpush3.msra.mxu0 %v3277_v13 }
 0x168   :  { %2790 = vmatprep.subr.mxu0 %v3892_v46 }
 0x169   :  { %2791 = vmatpush3.msra.mxu0 %v3295_v32 }
 0x16a   :  { %2830 = vmatprep.subr.mxu0 %v3892_v46 }
 0x1f8   :  { %v837_v50 = vpop.f32.mrf.mxu1 }
 0x1fa   :  { %v2731_v53 = vpop.f32.mrf.mxu1 }
 0x1fc   :  { %v988_v56 = vpop.f32.mrf.mxu1 }
 0x1fe   :  { %v2745_v57 = vpop.f32.mrf.mxu1 }
 0x200   :  { %v756_v41 = vpop.f32.mrf.mxu0  ;;  %v1138_v52 = vpop.f32.mrf.mxu1 }
 0x201   :  { %v838_v60 = vadd.f32 %v837_v50, %v756_v41 }
 0x202   :  { %v2724_v54 = vpop.f32.mrf.mxu0  ;;  %v2759_v1 = vpop.f32.mrf.mxu1 }
 0x204   :  { %v913_v49 = vpop.f32.mrf.mxu0 }
 0x205   :  { %v914_v36 = vadd.f32 %v913_v49, %v838_v60 }
 0x206   :  { %v2738_v14 = vpop.f32.mrf.mxu0 }
 0x207   :  { %v989_v33 = vadd.f32 %v988_v56, %v914_v36 }
 0x208   :  { %v1065_v26 = vpop.f32.mrf.mxu0 }
 0x209   :  { %v1066_v9 = vadd.f32 %v1065_v26, %v989_v33 }
 0x20a   :  { %v2752_v51 = vpop.f32.mrf.mxu0 }
 0x20b   :  { %v1139_v62 = vadd.f32 %v1138_v52, %v1066_v9 }
 0x20d   :  { %v3640_v42 = vsub.f32 %v3900_v0, %v1139_v62 }
 0x20f   :  { %v1143_v7 = vmul.f32 %v3640_v42, %v3640_v42 }
 0x211   :  { %v3644_v58 = vand.u32 4294901760, %v1143_v7 }
 0x213   :  { %2828 = vmatmul.mubr.f32.vlgmr.msra.gmra.mxu1 %v3644_v58  ;;  %v3648_v39 = vsub.f32 %v1143_v7, %v3644_v58 }
 0x214   :  { %2866 = vmatpush3.msra.mxu1 %v3077_v4  ;;  %2897 = vmatprep.mubr.msk.f32.mxu1 %vm3040_vm0, %v3892_v46 }
 0x215   :  { %2867 = vmatprep.subr.mxu1 %v3892_v46  ;;  %v1227_v19 = vand.u32 4294901760, %v3648_v39 }
 0x216   :  { %2868 = vmatpush3.msra.mxu1 %v3079_v5 }
 0x217   :  { %2869 = vmatprep.subr.mxu1 %v3892_v46  ;;  %v1228_v2 = vsub.f32 %v3648_v39, %v1227_v19 }
 0x218   :  { %2870 = vmatpush3.msra.mxu1 %v3081_v6 }
 0x219   :  { %2871 = vmatprep.subr.mxu1 %v3892_v46  ;;  %v1229_v23 = vand.u32 4294901760, %v1228_v2 }
 0x21a   :  { %2872 = vmatpush3.msra.mxu1 %v3093_v10 }
 0x21b   :  { %2873 = vmatprep.subr.mxu1 %v3892_v46  ;;  %2793 = vmatmul.mubr.f32.vlgmr.msra.gmra.mxu0 %v1229_v23 }
 0x21c   :  { %2831 = vmatpush3.msra.mxu0 %v3111_v15  ;;  %2874 = vmatpush3.msra.mxu1 %v3095_v11  ;;  %v3901_v15 = vld [vmem:[#allocation23_spill] sm:$0xff] }
 0x21d   :  { %2832 = vmatprep.subr.mxu0 %v3892_v46  ;;  %2875 = vmatprep.subr.mxu1 %v3892_v46 }
 0x21e   :  { %2833 = vmatpush3.msra.mxu0 %v3114_v16  ;;  %2876 = vmatpush3.msra.mxu1 %v3097_v12  ;;  %v3902_v16 = vld [vmem:[#allocation26_spill] sm:$0xff] }
 0x21f   :  { %2834 = vmatprep.subr.mxu0 %v3892_v46  ;;  %2877 = vmatprep.subr.mxu1 %v3892_v46 }
 0x220   :  { %2835 = vmatpush3.msra.mxu0 %v3119_v18  ;;  %2878 = vmatpush3.msra.mxu1 %v3116_v17  ;;  %v3910_v18 = vld [vmem:[#allocation11_spill] sm:$0xff] }
 0x221   :  { %2836 = vmatprep.subr.mxu0 %v3892_v46  ;;  %2879 = vmatprep.subr.mxu1 %v3892_v46 }
 0x222   :  { %2837 = vmatpush3.msra.mxu0 %v3126_v20  ;;  %2880 = vmatpush3.msra.mxu1 %v3141_v25  ;;  %v3911_v20 = vld [vmem:[#allocation14_spill] sm:$0xff] }
 0x223   :  { %2838 = vmatprep.subr.mxu0 %v3892_v46  ;;  %2881 = vmatprep.subr.mxu1 %v3892_v46 }
 0x224   :  { %2839 = vmatpush3.msra.mxu0 %v3129_v21  ;;  %2882 = vmatpush3.msra.mxu1 %v3150_v28  ;;  %v3912_v21 = vld [vmem:[#allocation16_spill] sm:$0xff] }
 0x225   :  { %2840 = vmatprep.subr.mxu0 %v3892_v46  ;;  %2883 = vmatprep.subr.mxu1 %v3892_v46 }
 0x226   :  { %2841 = vmatpush3.msra.mxu0 %v3156_v30  ;;  %2884 = vmatpush3.msra.mxu1 %v3169_v35  ;;  %v3915_v30 = vld [vmem:[#allocation22_spill] sm:$0xff] }
 0x227   :  { %2842 = vmatprep.subr.mxu0 %v3892_v46  ;;  %2885 = vmatprep.subr.mxu1 %v3892_v46 }
 0x228   :  { %2843 = vmatpush3.msra.mxu0 %v3166_v34  ;;  %2886 = vmatpush3.msra.mxu1 %v3197_v45  ;;  %v3916_v34 = vld [vmem:[#allocation25_spill] sm:$0xff] }
 0x229   :  { %2844 = vmatprep.subr.mxu0 %v3892_v46  ;;  %2887 = vmatprep.subr.mxu1 %v3892_v46 }
 0x22a   :  { %2845 = vmatpush3.msra.mxu0 %v3191_v43  ;;  %2888 = vmatpush3.msra.mxu1 %v3207_v48  ;;  %v3918_v43 = vld [vmem:[#allocation30_spill] sm:$0xff] }
 0x22b   :  { %2846 = vmatprep.subr.mxu0 %v3892_v46  ;;  %2889 = vmatprep.subr.mxu1 %v3892_v46 }
 0x22c   :  { %2847 = vmatpush3.msra.mxu0 %v3203_v47  ;;  %2890 = vmatpush3.msra.mxu1 %v3243_v59  ;;  %v1789_v47 = vld [vmem:[%s3832_s3 + $0x8] sm:$0xff] }
 0x22d   :  { %2848 = vmatprep.subr.mxu0 %v3892_v46  ;;  %2891 = vmatprep.subr.mxu1 %v3892_v46 }
 0x22e   :  { %2849 = vmatpush3.msra.mxu0 %v3230_v55  ;;  %2892 = vmatpush3.msra.mxu1 %v3256_v63  ;;  %v1822_v55 = vand.u32 4294901760, %v1789_v47 }
 0x22f   :  { %2850 = vmatprep.subr.mxu0 %v3892_v46  ;;  %2893 = vmatprep.subr.mxu1 %v3892_v46 }
 0x230   :  { %2851 = vmatpush3.msra.mxu0 %v3249_v61  ;;  %2894 = vmatpush3.msra.mxu1 %v3277_v13  ;;  %v1900_v61 = vsub.f32 %v1789_v47, %v1822_v55 }
 0x231   :  { %2852 = vmatprep.subr.mxu0 %v3892_v46  ;;  %2895 = vmatprep.subr.mxu1 %v3892_v46 }
 0x232   :  { %2853 = vmatpush3.msra.mxu0 %v3271_v8  ;;  %2896 = vmatpush3.msra.mxu1 %v3295_v32  ;;  %v1901_v8 = vand.u32 4294901760, %v1900_v61 }
 0x233   :  { %2854 = vmatprep.subr.mxu0 %v3892_v46  ;;  %2898 = vmatmul.mubr.f32.vlgmr.msra.gmra.mxu1 %v1227_v19 }
 0x234   :  { %2935 = vmatprep.subr.mxu1 %v3892_v46  ;;  %2855 = vmatpush3.msra.mxu0 %v3291_v31  ;;  %v1902_v31 = vsub.f32 %v1900_v61, %v1901_v8 }
 0x235   :  { %2936 = vmatpush3.msra.mxu1 %v3077_v4  ;;  %2856 = vmatprep.subr.mxu0 %v3892_v46  ;;  %v3903_v4 = vld [vmem:[#allocation29_spill] sm:$0xff] }
 0x236   :  { %2937 = vmatprep.subr.mxu1 %v3892_v46  ;;  %2857 = vmatpush3.msra.mxu0 %v3901_v15  ;;  %v1903_v22 = vand.u32 4294901760, %v1902_v31 }
 0x237   :  { %2938 = vmatpush3.msra.mxu1 %v3079_v5  ;;  %2858 = vmatprep.subr.mxu0 %v3892_v46  ;;  %v3904_v5 = vld [vmem:[#allocation5_spill] sm:$0xff] }
 0x238   :  { %2939 = vmatprep.subr.mxu1 %v3892_v46  ;;  %2859 = vmatpush3.msra.mxu0 %v3902_v16 }
 0x239   :  { %2940 = vmatpush3.msra.mxu1 %v3081_v6  ;;  %2860 = vmatprep.subr.mxu0 %v3892_v46  ;;  %v3905_v6 = vld [vmem:[#allocation6_spill] sm:$0xff] }
 0x23a   :  { %2941 = vmatprep.subr.mxu1 %v3892_v46  ;;  %2861 = vmatpush3.msra.mxu0 %v3903_v4 }
 0x23b   :  { %2862 = vmatprep.mubr.msk.f32.mxu0 %vm3040_vm0, %v3892_v46  ;;  %2942 = vmatpush3.msra.mxu1 %v3093_v10  ;;  %v3906_v10 = vld [vmem:[#allocation7_spill] sm:$0xff] }
 0x23c   :  { %2863 = vmatmul.mubr.f32.vlgmr.msra.gmra.mxu0 %v3648_v39  ;;  %2900 = vmatprep.subr.mxu0 %v3892_v46 }
 0x23d   :  { %2943 = vmatprep.subr.mxu1 %v3892_v46  ;;  %2901 = vmatpush3.msra.mxu0 %v3904_v5 }
 0x23e   :  { %2944 = vmatpush3.msra.mxu1 %v3095_v11  ;;  %2902 = vmatprep.subr.mxu0 %v3892_v46  ;;  %v3907_v11 = vld [vmem:[#allocation8_spill] sm:$0xff] }
 0x23f   :  { %2945 = vmatprep.subr.mxu1 %v3892_v46  ;;  %2903 = vmatpush3.msra.mxu0 %v3905_v6 }
 0x240   :  { %2946 = vmatpush3.msra.mxu1 %v3097_v12  ;;  %2904 = vmatprep.subr.mxu0 %v3892_v46  ;;  %v3908_v12 = vld [vmem:[#allocation9_spill] sm:$0xff] }
 0x241   :  { %2947 = vmatprep.subr.mxu1 %v3892_v46  ;;  %2905 = vmatpush3.msra.mxu0 %v3906_v10 }
 0x242   :  { %2948 = vmatpush3.msra.mxu1 %v3116_v17  ;;  %2906 = vmatprep.subr.mxu0 %v3892_v46  ;;  %v3909_v17 = vld [vmem:[#allocation10_spill] sm:$0xff] }
 0x243   :  { %2949 = vmatprep.subr.mxu1 %v3892_v46  ;;  %2907 = vmatpush3.msra.mxu0 %v3907_v11 }
 0x244   :  { %2950 = vmatpush3.msra.mxu1 %v3141_v25  ;;  %2908 = vmatprep.subr.mxu0 %v3892_v46  ;;  %v3913_v25 = vld [vmem:[#allocation18_spill] sm:$0xff] }
 0x245   :  { %2951 = vmatprep.subr.mxu1 %v3892_v46  ;;  %2909 = vmatpush3.msra.mxu0 %v3908_v12 }
 0x246   :  { %2952 = vmatpush3.msra.mxu1 %v3150_v28  ;;  %2910 = vmatprep.subr.mxu0 %v3892_v46  ;;  %v3914_v28 = vld [vmem:[#allocation20_spill] sm:$0xff] }
 0x247   :  { %2953 = vmatprep.subr.mxu1 %v3892_v46  ;;  %2911 = vmatpush3.msra.mxu0 %v3909_v17 }
 0x248   :  { %2954 = vmatpush3.msra.mxu1 %v3169_v35  ;;  %2912 = vmatprep.subr.mxu0 %v3892_v46  ;;  %v3917_v35 = vld [vmem:[#allocation28_spill] sm:$0xff] }
 0x249   :  { %2955 = vmatprep.subr.mxu1 %v3892_v46  ;;  %2913 = vmatpush3.msra.mxu0 %v3910_v18 }
 0x24a   :  { %2956 = vmatpush3.msra.mxu1 %v3197_v45  ;;  %2914 = vmatprep.subr.mxu0 %v3892_v46  ;;  %v3919_v45 = vld [vmem:[#allocation31_spill] sm:$0xff] }
 0x24b   :  { %2957 = vmatprep.subr.mxu1 %v3892_v46  ;;  %2915 = vmatpush3.msra.mxu0 %v3911_v20 }
 0x24c   :  { %2958 = vmatpush3.msra.mxu1 %v3207_v48  ;;  %2916 = vmatprep.subr.mxu0 %v3892_v46  ;;  %v1788_v48 = vld [vmem:[%s3832_s3] sm:$0xff]  ;;  %s3041_s3 = smov [#allocation2]  }
 0x24d   :  { %2959 = vmatprep.subr.mxu1 %v3892_v46  ;;  %2917 = vmatpush3.msra.mxu0 %v3912_v21  ;;  %s2260_s28 = sshll.u32 %s3041_s3, 4  ;;  %s2261_s28 = int_to_ptr.vmem [resolvable:$true] %s2260_s28 }
 0x24e   :  { %2960 = vmatpush3.msra.mxu1 %v3243_v59  ;;  %2918 = vmatprep.subr.mxu0 %v3892_v46  ;;  %v1825_v59 = vand.u32 4294901760, %v1788_v48  ;;  %s3017_s29 = scalar_lea.vmem %s2261_s28, 64  ;;  %p3022_p1 = scmp.lt.s32.totalorder %s2261_s28, %s2261_s28 }
 0x24f   :  { %2961 = vmatprep.subr.mxu1 %v3892_v46  ;;  %2919 = vmatpush3.msra.mxu0 %v3913_v25  ;;  %p3018_p0 = scmp.ne.s32.totalorder %s2261_s28, %s3017_s29  ;;  %p3023_p2 = scmp.lt.s32.totalorder %s3017_s29, %s3017_s29 }
 0x250   :  { %2962 = vmatpush3.msra.mxu1 %v3256_v63  ;;  %2920 = vmatprep.subr.mxu0 %v3892_v46  ;;  %v3801_v63 = vsub.f32 %v1788_v48, %v1825_v59 }
 0x251   :  { %2963 = vmatprep.subr.mxu1 %v3892_v46  ;;  %2921 = vmatpush3.msra.mxu0 %v3914_v28  ;;  %p3024_p3 = por %p3023_p2, %p3022_p1 }
 0x252   :  { %2964 = vmatpush3.msra.mxu1 %v3277_v13  ;;  %2922 = vmatprep.subr.mxu0 %v3892_v46  ;;  %v1908_v13 = vand.u32 4294901760, %v3801_v63 }
 0x253   :  { %2965 = vmatprep.subr.mxu1 %v3892_v46  ;;  %2923 = vmatpush3.msra.mxu0 %v3915_v30  ;;  %p3025_p4 = pnand %p3024_p3, %p3018_p0 }
 0x254   :  { %2966 = vmatpush3.msra.mxu1 %v3295_v32  ;;  %2967 = vmatprep.mubr.msk.f32.mxu1 %vm3040_vm0, %v3892_v46  ;;  %v1909_v32 = vsub.f32 %v3801_v63, %v1908_v13 }
 0x255   :  { %2924 = vmatprep.subr.mxu0 %v3892_v46  ;;  %2968 = vmatmul.mubr.f32.vlgmr.msra.gmra.mxu1 %v3644_v58 }
 0x256   :  { %2925 = vmatpush3.msra.mxu0 %v3916_v34  ;;  %2932 = vmatprep.mubr.msk.f32.mxu0 %vm3040_vm0, %v3892_v46  ;;  %v1910_v3 = vand.u32 4294901760, %v1909_v32 }
 0x257   :  { %2926 = vmatprep.subr.mxu0 %v3892_v46  ;;  %2977 = vmatprep.subr.mxu1 %v3892_v46 }
 0x258   :  { %2927 = vmatpush3.msra.mxu0 %v3917_v35  ;;  %2981 = vmatprep.mubr.msk.f32.mxu1 %vm3040_vm0, %v3892_v46 }
 0x259   :  { %2928 = vmatprep.subr.mxu0 %v3892_v46  ;;  %2978 = vmatpush3.msra.mxu1 %v1903_v22 }
 0x25a   :  { %2929 = vmatpush3.msra.mxu0 %v3918_v43  ;;  %2979 = vmatprep.subr.mxu1 %v3892_v46 }
 0x25b   :  { %2930 = vmatprep.subr.mxu0 %v3892_v46  ;;  %2980 = vmatpush3.msra.mxu1 %v1910_v3 }
 0x25c   :  { %2931 = vmatpush3.msra.mxu0 %v3919_v45  ;;  %2991 = vmatprep.subr.mxu1 %v3892_v46 }
 0x25d   :  { %2933 = vmatmul.mubr.f32.vlgmr.msra.gmra.mxu0 %v3644_v58  ;;  %2970 = vmatprep.subr.mxu0 %v3892_v46 }
 0x25e   :  { %2974 = vmatprep.mubr.msk.f32.mxu0 %vm3040_vm0, %v3892_v46  ;;  %2971 = vmatpush3.msra.mxu0 %v1822_v55 }
 0x25f   :  { %2972 = vmatprep.subr.mxu0 %v3892_v46 }
 0x260   :  { %2973 = vmatpush3.msra.mxu0 %v1825_v59 }
 0x261   :  { %2984 = vmatprep.subr.mxu0 %v3892_v46 }
 0x2d3   :  { %v1382_v24 = vpop.f32.mrf.mxu1 }
 0x2d5   :  { %v2829_v27 = vpop.f32.mrf.mxu1 }
 0x2db   :  { %v1231_v29 = vpop.f32.mrf.mxu0 }
 0x2dc   :  { %v1383_v56 = vadd.f32 %v1382_v24, %v1231_v29 }
 0x2dd   :  { %v2794_v37 = vpop.f32.mrf.mxu0 }
 0x2f3   :  { %v1575_v38 = vpop.f32.mrf.mxu1 }
 0x2f5   :  { %v2899_v40 = vpop.f32.mrf.mxu1 }
 0x2fc   :  { %v1486_v44 = vpop.f32.mrf.mxu0 }
 0x2fd   :  { %v1487_v41 = vadd.f32 %v1486_v44, %v1383_v56 }
 0x2fe   :  { %v2864_v50 = vpop.f32.mrf.mxu0 }
 0x2ff   :  { %v1576_v52 = vadd.f32 %v1575_v38, %v1487_v41 }
 0x315   :  { %v1781_v53 = vpop.f32.mrf.mxu1 }
 0x317   :  { %v2969_v57 = vpop.f32.mrf.mxu1 }
 0x31d   :  { %v1694_v54 = vpop.f32.mrf.mxu0 }
 0x31e   :  { %v1695_v1 = vadd.f32 %v1694_v54, %v1576_v52 }
 0x31f   :  { %v2934_v60 = vpop.f32.mrf.mxu0 }
 0x320   :  { %v1782_v49 = vadd.f32 %v1781_v53, %v1695_v1 }
 0x322   :  { %v1785_v36 = vmul.f32 0.125, %v1782_v49 }
 0x324   :  { %v1786_v14 = vadd.f32 1e-05, %v1785_v36 }
 0x326   :  { %3015 = vrsqrt.f32 %v1786_v14 }
 0x333   :  { %v3016_v33 = vpop.eup %3015 }
 0x334   :  { %v1791_v26 = vsel %vm679_vm1, %v3016_v33, 0 }
 0x335   :  { %v1860_v9 = vand.u32 4294901760, %v1791_v26 }
 0x337   :  { %v1861_v51 = vsub.f32 %v1791_v26, %v1860_v9  ;;  %2982 = vmatmul.mubr.f32.vlgmr.msra.gmra.mxu1 %v1860_v9 }
 0x338   :  { %2992 = vmatpush3.msra.mxu1 %v1822_v55  ;;  %2995 = vmatprep.mubr.msk.f32.mxu1 %vm3040_vm0, %v3892_v46 }
 0x339   :  { %2993 = vmatprep.subr.mxu1 %v3892_v46  ;;  %v1862_v62 = vand.u32 4294901760, %v1861_v51 }
 0x33a   :  { %2994 = vmatpush3.msra.mxu1 %v1825_v59 }
 0x33b   :  { %2996 = vmatmul.mubr.f32.vlgmr.msra.gmra.mxu1 %v1862_v62  ;;  %3005 = vmatprep.subr.mxu1 %v3892_v46  ;;  %v1863_v0 = vsub.f32 %v1861_v51, %v1862_v62 }
 0x33c   :  { %3006 = vmatpush3.msra.mxu1 %v1822_v55  ;;  %3009 = vmatprep.mubr.msk.f32.mxu1 %vm3040_vm0, %v3892_v46 }
 0x33d   :  { %3007 = vmatprep.subr.mxu1 %v3892_v46  ;;  %v1864_v7 = vand.u32 4294901760, %v1863_v0 }
 0x33e   :  { %3008 = vmatpush3.msra.mxu1 %v1825_v59 }
 0x33f   :  { %2975 = vmatmul.mubr.f32.vlgmr.msra.gmra.mxu0 %v1864_v7  ;;  %3010 = vmatmul.mubr.f32.vlgmr.msra.gmra.mxu1 %v1860_v9 }
 0x340   :  { %2985 = vmatpush3.msra.mxu0 %v1900_v61  ;;  %2988 = vmatprep.mubr.msk.f32.mxu0 %vm3040_vm0, %v3892_v46 }
 0x341   :  { %2986 = vmatprep.subr.mxu0 %v3892_v46 }
 0x342   :  { %2987 = vmatpush3.msra.mxu0 %v3801_v63 }
 0x343   :  { %2998 = vmatprep.subr.mxu0 %v3892_v46  ;;  %2989 = vmatmul.mubr.f32.vlgmr.msra.gmra.mxu0 %v1861_v51 }
 0x344   :  { %2999 = vmatpush3.msra.mxu0 %v1901_v8  ;;  %3002 = vmatprep.mubr.msk.f32.mxu0 %vm3040_vm0, %v3892_v46 }
 0x345   :  { %3000 = vmatprep.subr.mxu0 %v3892_v46 }
 0x346   :  { %3001 = vmatpush3.msra.mxu0 %v1908_v13 }
 0x347   :  { %3003 = vmatmul.mubr.f32.vlgmr.msra.gmra.mxu0 %v1860_v9 }
 0x3f7   :  { %v1947_v58 = vpop.f32.mrf.mxu1 }
 0x3f9   :  { %v2983_v39 = vpop.f32.mrf.mxu1 }
 0x3fb   :  { %v2098_v19 = vpop.f32.mrf.mxu1 }
 0x3fd   :  { %v2997_v2 = vpop.f32.mrf.mxu1 }
 0x3ff   :  { %v1866_v23 = vpop.f32.mrf.mxu0  ;;  %v2248_v15 = vpop.f32.mrf.mxu1 }
 0x400   :  { %v1948_v5 = vadd.f32 %v1947_v58, %v1866_v23 }
 0x401   :  { %v2976_v16 = vpop.f32.mrf.mxu0  ;;  %v3011_v4 = vpop.f32.mrf.mxu1 }
 0x403   :  { %v2023_v6 = vpop.f32.mrf.mxu0 }
 0x404   :  { %v2024_v10 = vadd.f32 %v2023_v6, %v1948_v5 }
 0x405   :  { %v2990_v11 = vpop.f32.mrf.mxu0 }
 0x406   :  { %v2099_v12 = vadd.f32 %v2098_v19, %v2024_v10 }
 0x407   :  { %v2175_v17 = vpop.f32.mrf.mxu0 }
 0x408   :  { %v2176_v18 = vadd.f32 %v2175_v17, %v2099_v12 }
 0x409   :  { %v3004_v20 = vpop.f32.mrf.mxu0 }
 0x40a   :  { %v2249_v46 = vadd.f32 %v2248_v15, %v2176_v18 }
 0x40c   :  { %v2252_v21 = vmul.f32 %v2249_v46, %v3640_v42 }
 0x40e   :  { %2253 = vst [vmem:[#allocation2] sm:$0xf] %v2252_v21 }
 0x40f   :  { %3028 = shalt.err (!%p3025_p4)
}
 0x410   :  { %2263 = dma.vmem_to_hbm [thread:$0]  %s2261_s28, 64, %s3833_s4, [#allocation3]  }
 0x411   :  { %3037 = dma.done.wait [#allocation3], 64  }
 0x412   :  { %3038 = vsyncadd [#allocation3], 4294967232 }
 0x413   :  { %2267 = vsyncpa [#allocation3], 1 }

// kernel: tpu_custom_call.1
= control target key start
LH: loop header
LB: loop body
LE: loop exit
PB: predicated region body
PF: predicated region fallthrough
CT: control target
= control target key end

     0   :  { %v3860_v3 = vmov 0.0   ;;  %vm3040_vm0 = vmmov 0   ;;  %s3829_s0 = inlined_call_operand.vmem [shape: f32[4,128], index: 0, kind: input, shape index: {}]   ;;  %s3830_s1 = inlined_call_operand.vmem [shape: f32[128,16], index: 1, kind: input, shape index: {}]   ;;  %s3831_s2 = inlined_call_operand.vmem [shape: f32[16,128], index: 2, kind: input, shape index: {}]   ;;  %s3832_s3 = inlined_call_operand.vmem [shape: f32[16,128], index: 3, kind: input, shape index: {}]   ;;  %s3833_s4 = inlined_call_operand.hbm [shape: f32[4,128], index: 4, kind: output, shape index: {}]  }
   0x1   :  { %v34_v0 = vld [vmem:[%s3830_s1 + $0x78] sm:$0xff]  ;;  %v33_v1 = vld [vmem:[%s3830_s1 + $0x70] sm:$0xff]  ;;  %v32_v2 = vld [vmem:[%s3830_s1 + $0x68] sm:$0xff]  ;;  %2508 = vmatprep.subr.mxu0 %v3860_v3  ;;  %2543 = vmatprep.subr.mxu1 %v3860_v3 }
   0x2   :  { %v3077_v4 = vand.u32 4294901760, %v34_v0  ;;  %v3079_v5 = vand.u32 4294901760, %v33_v1  ;;  %v3081_v6 = vand.u32 4294901760, %v32_v2  ;;  %v31_v7 = vld [vmem:[%s3830_s1 + $0x60] sm:$0xff]  ;;  %v30_v8 = vld [vmem:[%s3830_s1 + $0x58] sm:$0xff]  ;;  %v29_v9 = vld [vmem:[%s3830_s1 + $0x50] sm:$0xff]  ;;  %2540 = vmatprep.mubr.msk.f32.mxu0 %vm3040_vm0, %v3860_v3  ;;  %2575 = vmatprep.mubr.msk.f32.mxu1 %vm3040_vm0, %v3860_v3 }
   0x3   :  { %v3093_v10 = vand.u32 4294901760, %v31_v7  ;;  %v3095_v11 = vand.u32 4294901760, %v30_v8  ;;  %v3097_v12 = vand.u32 4294901760, %v29_v9  ;;  %v28_v13 = vld [vmem:[%s3830_s1 + $0x48] sm:$0xff]  ;;  %v27_v14 = vld [vmem:[%s3830_s1 + $0x40] sm:$0xff]  ;;  %v26_v19 = vld [vmem:[%s3830_s1 + $0x38] sm:$0xff] }
   0x4   :  { %2509 = vmatpush3.msra.mxu0 %v3077_v4  ;;  %v3111_v15 = vsub.f32 %v34_v0, %v3077_v4  ;;  %v3114_v16 = vsub.f32 %v33_v1, %v3079_v5  ;;  %v3116_v17 = vand.u32 4294901760, %v28_v13  ;;  %v3119_v18 = vsub.f32 %v32_v2, %v3081_v6  ;;  %v25_v26 = vld [vmem:[%s3830_s1 + $0x30] sm:$0xff] }
   0x5   :  { %2510 = vmatprep.subr.mxu0 %v3860_v3  ;;  %v3126_v20 = vsub.f32 %v31_v7, %v3093_v10  ;;  %v3129_v21 = vsub.f32 %v30_v8, %v3095_v11  ;;  %v3141_v25 = vand.u32 4294901760, %v27_v14  ;;  %v3150_v28 = vand.u32 4294901760, %v26_v19 }
   0x6   :  { %2511 = vmatpush3.msra.mxu0 %v3079_v5  ;;  %v3133_v22 = vand.u32 4294901760, %v3111_v15  ;;  %v3136_v23 = vand.u32 4294901760, %v3114_v16  ;;  %v3139_v24 = vand.u32 4294901760, %v3119_v18  ;;  %v3156_v30 = vsub.f32 %v29_v9, %v3097_v12 }
   0x7   :  { %2512 = vmatprep.subr.mxu0 %v3860_v3  ;;  %v3148_v27 = vand.u32 4294901760, %v3126_v20  ;;  %v3153_v29 = vand.u32 4294901760, %v3129_v21  ;;  %v3166_v34 = vsub.f32 %v28_v13, %v3116_v17 }
   0x8   :  { %3863 = vst [vmem:[#allocation5_spill] sm:$0xff] %v3133_v22  ;;  %3864 = vst [vmem:[#allocation6_spill] sm:$0xff] %v3136_v23  ;;  %2513 = vmatpush3.msra.mxu0 %v3081_v6  ;;  %v130_v31 = vsub.f32 %v3111_v15, %v3133_v22  ;;  %v137_v32 = vsub.f32 %v3114_v16, %v3136_v23  ;;  %v144_v33 = vsub.f32 %v3119_v18, %v3139_v24 }
   0x9   :  { %3865 = vst [vmem:[#allocation7_spill] sm:$0xff] %v3139_v24  ;;  %3866 = vst [vmem:[#allocation8_spill] sm:$0xff] %v3148_v27 }
   0xa   :  { %3867 = vst [vmem:[#allocation9_spill] sm:$0xff] %v3153_v29 }
   0xb   :  { %9 = vsyncpa [#allocation3], 0  ;;  %2514 = vmatprep.subr.mxu0 %v3860_v3  ;;  %v3169_v35 = vand.u32 4294901760, %v25_v26  ;;  %v24_v36 = vld [vmem:[%s3830_s1 + $0x28] sm:$0xff]  ;;  %v3175_v37 = vand.u32 4294901760, %v130_v31  ;;  %v3177_v38 = vand.u32 4294901760, %v137_v32  ;;  %v151_v39 = vsub.f32 %v3126_v20, %v3148_v27 }
   0xc   :  { %2515 = vmatpush3.msra.mxu0 %v3093_v10  ;;  %v3182_v40 = vand.u32 4294901760, %v3156_v30  ;;  %v23_v41 = vld [vmem:[%s3830_s1 + $0x20] sm:$0xff]  ;;  %v158_v42 = vsub.f32 %v3129_v21, %v3153_v29  ;;  %v3191_v43 = vsub.f32 %v27_v14, %v3141_v25  ;;  %v3195_v44 = vand.u32 4294901760, %v144_v33  ;;  %v22_v49 = vld [vmem:[%s3830_s1 + $0x18] sm:$0xff]  ;;  %v21_v54 = vld [vmem:[%s3830_s1 + $0x10] sm:$0xff] }
   0xd   :  { %2516 = vmatprep.subr.mxu0 %v3860_v3  ;;  %2544 = vmatpush3.msra.mxu1 %v3175_v37  ;;  %v3197_v45 = vand.u32 4294901760, %v24_v36  ;;  %v3200_v46 = vand.u32 4294901760, %v3166_v34  ;;  %v3203_v47 = vsub.f32 %v26_v19, %v3150_v28  ;;  %v3207_v48 = vand.u32 4294901760, %v23_v41  ;;  %v3215_v50 = vld [vmem:[%s3829_s0] sm:$0xf]  ;;  %v20_v60 = vld [vmem:[%s3830_s1 + $0x8] sm:$0xff] }
   0xe   :  { %3868 = vst [vmem:[#allocation10_spill] sm:$0xff] %v3182_v40  ;;  %2517 = vmatpush3.msra.mxu0 %v3095_v11  ;;  %2545 = vmatprep.subr.mxu1 %v3860_v3  ;;  %3870 = vst [vmem:[#allocation12_spill] sm:$0xff] %v3215_v50  ;;  %v3219_v51 = vand.u32 4294901760, %v151_v39  ;;  %v165_v52 = vsub.f32 %v3156_v30, %v3182_v40  ;;  %v3224_v53 = vand.u32 4294901760, %v3191_v43  ;;  %v3234_v56 = vand.u32 4294901760, %v158_v42  ;;  %v19_v7 = vld [vmem:[%s3830_s1] sm:$0xff] }
   0xf   :  { %3869 = vst [vmem:[#allocation11_spill] sm:$0xff] %v3200_v46  ;;  %2518 = vmatprep.subr.mxu0 %v3860_v3  ;;  %2546 = vmatpush3.msra.mxu1 %v3177_v38  ;;  %v3230_v55 = vsub.f32 %v25_v26, %v3169_v35  ;;  %v3237_v57 = vand.u32 4294901760, %v3203_v47  ;;  %v172_v58 = vsub.f32 %v3166_v34, %v3200_v46  ;;  %v3243_v59 = vand.u32 4294901760, %v22_v49 }
  0x10   :  { %2519 = vmatpush3.msra.mxu0 %v3097_v12  ;;  %3871 = vst [vmem:[#allocation13_spill] sm:$0xff] %v3219_v51  ;;  %3872 = vst [vmem:[#allocation14_spill] sm:$0xff] %v3224_v53  ;;  %2547 = vmatprep.subr.mxu1 %v3860_v3  ;;  %v3249_v61 = vsub.f32 %v24_v36, %v3197_v45  ;;  %v3252_v62 = vand.u32 4294901760, %v3215_v50  ;;  %v3256_v63 = vand.u32 4294901760, %v21_v54  ;;  %v3260_v0 = vand.u32 4294901760, %v165_v52 }
  0x11   :  { %2520 = vmatprep.subr.mxu0 %v3860_v3  ;;  %3873 = vst [vmem:[#allocation15_spill] sm:$0xff] %v3234_v56  ;;  %3874 = vst [vmem:[#allocation16_spill] sm:$0xff] %v3237_v57  ;;  %2548 = vmatpush3.msra.mxu1 %v3195_v44  ;;  %v179_v1 = vsub.f32 %v3191_v43, %v3224_v53  ;;  %v3265_v2 = vand.u32 4294901760, %v3230_v55  ;;  %v3271_v8 = vsub.f32 %v23_v41, %v3207_v48  ;;  %vm679_vm1 = vcmask 130048  }
  0x12   :  { %2521 = vmatpush3.msra.mxu0 %v3116_v17  ;;  %2549 = vmatprep.subr.mxu1 %v3860_v3  ;;  %3875 = vst [vmem:[#allocation17_spill] sm:$0xff] %v3260_v0  ;;  %v186_v9 = vsub.f32 %v3203_v47, %v3237_v57  ;;  %v3277_v13 = vand.u32 4294901760, %v20_v60  ;;  %v3281_v14 = vand.u32 4294901760, %v172_v58  ;;  %v3284_v19 = vand.u32 4294901760, %v3249_v61 }
  0x13   :  { %2522 = vmatprep.subr.mxu0 %v3860_v3  ;;  %2550 = vmatpush3.msra.mxu1 %v3219_v51  ;;  %3876 = vst [vmem:[#allocation18_spill] sm:$0xff] %v3265_v2  ;;  %v3288_v26 = vsub.f32 %v3215_v50, %v3252_v62  ;;  %v3291_v31 = vsub.f32 %v22_v49, %v3243_v59  ;;  %v3295_v32 = vand.u32 4294901760, %v19_v7  ;;  %v3299_v33 = vand.u32 4294901760, %v179_v1 }
  0x14   :  { %2523 = vmatpush3.msra.mxu0 %v3141_v25  ;;  %2551 = vmatprep.subr.mxu1 %v3860_v3  ;;  %3877 = vst [vmem:[#allocation19_spill] sm:$0xff] %v3281_v14  ;;  %3878 = vst [vmem:[#allocation20_spill] sm:$0xff] %v3284_v19  ;;  %v193_v36 = vsub.f32 %v3230_v55, %v3265_v2  ;;  %v3304_v39 = vand.u32 4294901760, %v3271_v8  ;;  %v3307_v41 = vsub.f32 %v21_v54, %v3256_v63 }
  0x15   :  { %2524 = vmatprep.subr.mxu0 %v3860_v3  ;;  %2552 = vmatpush3.msra.mxu1 %v3234_v56  ;;  %3879 = vst [vmem:[#allocation21_spill] sm:$0xff] %v3299_v33  ;;  %v3311_v42 = vand.u32 4294901760, %v186_v9  ;;  %v200_v49 = vsub.f32 %v3249_v61, %v3284_v19  ;;  %v3319_v58 = vand.u32 4294901760, %v3291_v31  ;;  %v3322_v54 = vsub.f32 %v20_v60, %v3277_v13 }
  0x16   :  { %2525 = vmatpush3.msra.mxu0 %v3150_v28  ;;  %2553 = vmatprep.subr.mxu1 %v3860_v3  ;;  %3880 = vst [vmem:[#allocation22_spill] sm:$0xff] %v3304_v39  ;;  %3881 = vst [vmem:[#allocation23_spill] sm:$0xff] %v3307_v41  ;;  %v3328_v1 = vand.u32 4294901760, %v193_v36  ;;  %v207_v9 = vsub.f32 %v3271_v8, %v3304_v39  ;;  %v3333_v52 = vand.u32 4294901760, %v3307_v41  ;;  %v3888_v36 = vand.u32 4294901760, %v3288_v26 }
  0x17   :  { %2526 = vmatprep.subr.mxu0 %v3860_v3  ;;  %2554 = vmatpush3.msra.mxu1 %v3260_v0  ;;  %3882 = vst [vmem:[#allocation24_spill] sm:$0xff] %v3311_v42  ;;  %3883 = vst [vmem:[#allocation25_spill] sm:$0xff] %v3319_v58  ;;  %v3336_v50 = vsub.f32 %v19_v7, %v3295_v32  ;;  %v3342_v60 = vand.u32 4294901760, %v200_v49  ;;  %v3350_v7 = vand.u32 4294901760, %v3322_v54 }
  0x18   :  { %2527 = vmatpush3.msra.mxu0 %v3169_v35  ;;  %2555 = vmatprep.subr.mxu1 %v3860_v3  ;;  %3884 = vst [vmem:[#allocation26_spill] sm:$0xff] %v3322_v54  ;;  %3885 = vst [vmem:[#allocation27_spill] sm:$0xff] %v3328_v1  ;;  %v3356_v49 = vand.u32 4294901760, %v207_v9 }
  0x19   :  { %2528 = vmatprep.subr.mxu0 %v3860_v3  ;;  %2556 = vmatpush3.msra.mxu1 %v3281_v14  ;;  %3886 = vst [vmem:[#allocation28_spill] sm:$0xff] %v3333_v52  ;;  %3887 = vst [vmem:[#allocation29_spill] sm:$0xff] %v3336_v50  ;;  %v214_v14 = vsub.f32 %v3291_v31, %v3319_v58  ;;  %v228_v9 = vsub.f32 %v3322_v54, %v3350_v7 }
  0x1a   :  { %2529 = vmatpush3.msra.mxu0 %v3197_v45  ;;  %2557 = vmatprep.subr.mxu1 %v3860_v3  ;;  %3889 = vst [vmem:[#allocation30_spill] sm:$0xff] %v3350_v7 }
  0x1b   :  { %2530 = vmatprep.subr.mxu0 %v3860_v3  ;;  %2558 = vmatpush3.msra.mxu1 %v3299_v33  ;;  %v119_v33 = vsub.f32 %v3288_v26, %v3888_v36  ;;  %v3361_v36 = vand.u32 4294901760, %v3336_v50  ;;  %v3367_v56 = vand.u32 4294901760, %v214_v14  ;;  %v3382_v14 = vand.u32 4294901760, %v228_v9 }
  0x1c   :  { %2531 = vmatpush3.msra.mxu0 %v3207_v48  ;;  %2559 = vmatprep.subr.mxu1 %v3860_v3 }
  0x1d   :  { %2532 = vmatprep.subr.mxu0 %v3860_v3  ;;  %2560 = vmatpush3.msra.mxu1 %v3311_v42  ;;  %v221_v42 = vsub.f32 %v3307_v41, %v3333_v52  ;;  %3890 = vst [vmem:[#allocation31_spill] sm:$0xff] %v3361_v36  ;;  %v120_v0 = vand.u32 4294901760, %v119_v33  ;;  %v235_v51 = vsub.f32 %v3336_v50, %v3361_v36 }
  0x1e   :  { %2533 = vmatpush3.msra.mxu0 %v3243_v59  ;;  %2561 = vmatprep.subr.mxu1 %v3860_v3 }
  0x1f   :  { %2534 = vmatprep.subr.mxu0 %v3860_v3  ;;  %2562 = vmatpush3.msra.mxu1 %v3328_v1  ;;  %v3375_v1 = vand.u32 4294901760, %v221_v42  ;;  %v3388_v33 = vand.u32 4294901760, %v235_v51  ;;  %v3891_v51 = vand.u32 4294901760, %v3288_v26  ;;  %v677_v42 = vld [vmem:[%s3831_s2] sm:$0xff] }
  0x20   :  { %2535 = vmatpush3.msra.mxu0 %v3256_v63  ;;  %2563 = vmatprep.subr.mxu1 %v3860_v3 }
  0x21   :  { %2536 = vmatprep.subr.mxu0 %v3860_v3  ;;  %2564 = vmatpush3.msra.mxu1 %v3342_v60 }
  0x22   :  { %2537 = vmatpush3.msra.mxu0 %v3277_v13  ;;  %2565 = vmatprep.subr.mxu1 %v3860_v3 }
  0x23   :  { %2538 = vmatprep.subr.mxu0 %v3860_v3  ;;  %2566 = vmatpush3.msra.mxu1 %v3356_v49 }
  0x24   :  { %2539 = vmatpush3.msra.mxu0 %v3295_v32  ;;  %2567 = vmatprep.subr.mxu1 %v3860_v3 }
  0x25   :  { %2578 = vmatprep.subr.mxu0 %v3860_v3  ;;  %2541 = vmatmul.mubr.f32.vlgmr.msra.gmra.mxu0 %v120_v0  ;;  %v678_v0 = vld [vmem:[%s3831_s2 + $0x8] sm:$0xff] }
  0x26   :  { %2568 = vmatpush3.msra.mxu1 %v3367_v56  ;;  %2579 = vmatpush3.msra.mxu0 %v3111_v15 }
  0x27   :  { %2569 = vmatprep.subr.mxu1 %v3860_v3  ;;  %2580 = vmatprep.subr.mxu0 %v3860_v3 }
  0x28   :  { %2570 = vmatpush3.msra.mxu1 %v3375_v1  ;;  %2581 = vmatpush3.msra.mxu0 %v3114_v16 }
  0x29   :  { %2571 = vmatprep.subr.mxu1 %v3860_v3  ;;  %2582 = vmatprep.subr.mxu0 %v3860_v3 }
  0x2a   :  { %2572 = vmatpush3.msra.mxu1 %v3382_v14  ;;  %2583 = vmatpush3.msra.mxu0 %v3119_v18 }
  0x2b   :  { %2573 = vmatprep.subr.mxu1 %v3860_v3  ;;  %2584 = vmatprep.subr.mxu0 %v3860_v3 }
  0x2c   :  { %2574 = vmatpush3.msra.mxu1 %v3388_v33  ;;  %2585 = vmatpush3.msra.mxu0 %v3126_v20 }
  0x2d   :  { %2576 = vmatmul.mubr.f32.vlgmr.msra.gmra.mxu1 %v3252_v62  ;;  %2586 = vmatprep.subr.mxu0 %v3860_v3 }
  0x2e   :  { %2613 = vmatprep.subr.mxu1 %v3860_v3  ;;  %2587 = vmatpush3.msra.mxu0 %v3129_v21 }
  0x2f   :  { %2614 = vmatpush3.msra.mxu1 %v3077_v4  ;;  %2588 = vmatprep.subr.mxu0 %v3860_v3 }
  0x30   :  { %2615 = vmatprep.subr.mxu1 %v3860_v3  ;;  %2589 = vmatpush3.msra.mxu0 %v3156_v30 }
  0x31   :  { %2616 = vmatpush3.msra.mxu1 %v3079_v5  ;;  %2590 = vmatprep.subr.mxu0 %v3860_v3 }
  0x32   :  { %2617 = vmatprep.subr.mxu1 %v3860_v3  ;;  %2591 = vmatpush3.msra.mxu0 %v3166_v34 }
  0x33   :  { %2618 = vmatpush3.msra.mxu1 %v3081_v6  ;;  %2592 = vmatprep.subr.mxu0 %v3860_v3 }
  0x34   :  { %2619 = vmatprep.subr.mxu1 %v3860_v3  ;;  %2593 = vmatpush3.msra.mxu0 %v3191_v43 }
  0x35   :  { %2620 = vmatpush3.msra.mxu1 %v3093_v10  ;;  %2594 = vmatprep.subr.mxu0 %v3860_v3 }
  0x36   :  { %2621 = vmatprep.subr.mxu1 %v3860_v3  ;;  %2595 = vmatpush3.msra.mxu0 %v3203_v47 }
  0x37   :  { %2622 = vmatpush3.msra.mxu1 %v3095_v11  ;;  %2596 = vmatprep.subr.mxu0 %v3860_v3 }
  0x38   :  { %2623 = vmatprep.subr.mxu1 %v3860_v3  ;;  %2597 = vmatpush3.msra.mxu0 %v3230_v55 }
  0x39   :  { %2624 = vmatpush3.msra.mxu1 %v3097_v12  ;;  %2598 = vmatprep.subr.mxu0 %v3860_v3 }
  0x3a   :  { %2625 = vmatprep.subr.mxu1 %v3860_v3  ;;  %2599 = vmatpush3.msra.mxu0 %v3249_v61 }
  0x3b   :  { %2626 = vmatpush3.msra.mxu1 %v3116_v17  ;;  %2600 = vmatprep.subr.mxu0 %v3860_v3 }
  0x3c   :  { %2627 = vmatprep.subr.mxu1 %v3860_v3  ;;  %2601 = vmatpush3.msra.mxu0 %v3271_v8 }
  0x3d   :  { %2628 = vmatpush3.msra.mxu1 %v3141_v25  ;;  %2602 = vmatprep.subr.mxu0 %v3860_v3 }
  0x3e   :  { %2629 = vmatprep.subr.mxu1 %v3860_v3  ;;  %2603 = vmatpush3.msra.mxu0 %v3291_v31 }
  0x3f   :  { %2630 = vmatpush3.msra.mxu1 %v3150_v28  ;;  %2604 = vmatprep.subr.mxu0 %v3860_v3 }
  0x40   :  { %2631 = vmatprep.subr.mxu1 %v3860_v3  ;;  %2605 = vmatpush3.msra.mxu0 %v3307_v41 }
  0x41   :  { %2632 = vmatpush3.msra.mxu1 %v3169_v35  ;;  %2606 = vmatprep.subr.mxu0 %v3860_v3 }
  0x42   :  { %2633 = vmatprep.subr.mxu1 %v3860_v3  ;;  %2607 = vmatpush3.msra.mxu0 %v3322_v54 }
  0x43   :  { %2634 = vmatpush3.msra.mxu1 %v3197_v45  ;;  %2608 = vmatprep.subr.mxu0 %v3860_v3 }
  0x44   :  { %2635 = vmatprep.subr.mxu1 %v3860_v3  ;;  %2609 = vmatpush3.msra.mxu0 %v3336_v50 }
  0x45   :  { %2610 = vmatprep.mubr.msk.f32.mxu0 %vm3040_vm0, %v3860_v3  ;;  %2636 = vmatpush3.msra.mxu1 %v3207_v48 }
  0x46   :  { %2611 = vmatmul.mubr.f32.vlgmr.msra.gmra.mxu0 %v3288_v26  ;;  %2637 = vmatprep.subr.mxu1 %v3860_v3  ;;  %v712_v26 = vand.u32 4294901760, %v678_v0 }
  0x47   :  { %2648 = vmatprep.subr.mxu0 %v3860_v3  ;;  %2638 = vmatpush3.msra.mxu1 %v3243_v59 }
  0x48   :  { %2649 = vmatpush3.msra.mxu0 %v3133_v22  ;;  %2639 = vmatprep.subr.mxu1 %v3860_v3  ;;  %v3545_v9 = vsub.f32 %v678_v0, %v712_v26 }
  0x49   :  { %2650 = vmatprep.subr.mxu0 %v3860_v3  ;;  %2640 = vmatpush3.msra.mxu1 %v3256_v63 }
  0x4a   :  { %2651 = vmatpush3.msra.mxu0 %v3136_v23  ;;  %2641 = vmatprep.subr.mxu1 %v3860_v3 }
  0x4b   :  { %2652 = vmatprep.subr.mxu0 %v3860_v3  ;;  %2642 = vmatpush3.msra.mxu1 %v3277_v13 }
  0x4c   :  { %2653 = vmatpush3.msra.mxu0 %v3139_v24  ;;  %2643 = vmatprep.subr.mxu1 %v3860_v3 }
  0x4d   :  { %2654 = vmatprep.subr.mxu0 %v3860_v3  ;;  %2644 = vmatpush3.msra.mxu1 %v3295_v32 }
  0x4e   :  { %2645 = vmatprep.mubr.msk.f32.mxu1 %vm3040_vm0, %v3860_v3  ;;  %2655 = vmatpush3.msra.mxu0 %v3148_v27 }
  0x4f   :  { %2646 = vmatmul.mubr.f32.vlgmr.msra.gmra.mxu1 %v3891_v51  ;;  %2656 = vmatprep.subr.mxu0 %v3860_v3  ;;  %v715_v51 = vand.u32 4294901760, %v677_v42 }
  0x50   :  { %2683 = vmatprep.subr.mxu1 %v3860_v3  ;;  %2657 = vmatpush3.msra.mxu0 %v3153_v29 }
  0x51   :  { %2684 = vmatpush3.msra.mxu1 %v3077_v4  ;;  %2658 = vmatprep.subr.mxu0 %v3860_v3 }
  0x52   :  { %2685 = vmatprep.subr.mxu1 %v3860_v3  ;;  %2659 = vmatpush3.msra.mxu0 %v3182_v40 }
  0x53   :  { %2686 = vmatpush3.msra.mxu1 %v3079_v5  ;;  %2660 = vmatprep.subr.mxu0 %v3860_v3 }
  0x54   :  { %2687 = vmatprep.subr.mxu1 %v3860_v3  ;;  %2661 = vmatpush3.msra.mxu0 %v3200_v46 }
  0x55   :  { %2688 = vmatpush3.msra.mxu1 %v3081_v6  ;;  %2662 = vmatprep.subr.mxu0 %v3860_v3 }
  0x56   :  { %2689 = vmatprep.subr.mxu1 %v3860_v3  ;;  %2663 = vmatpush3.msra.mxu0 %v3224_v53 }
  0x57   :  { %2690 = vmatpush3.msra.mxu1 %v3093_v10  ;;  %2664 = vmatprep.subr.mxu0 %v3860_v3 }
  0x58   :  { %2691 = vmatprep.subr.mxu1 %v3860_v3  ;;  %2665 = vmatpush3.msra.mxu0 %v3237_v57 }
  0x59   :  { %2692 = vmatpush3.msra.mxu1 %v3095_v11  ;;  %2666 = vmatprep.subr.mxu0 %v3860_v3 }
  0x5a   :  { %2693 = vmatprep.subr.mxu1 %v3860_v3  ;;  %2667 = vmatpush3.msra.mxu0 %v3265_v2 }
  0x5b   :  { %2694 = vmatpush3.msra.mxu1 %v3097_v12  ;;  %2668 = vmatprep.subr.mxu0 %v3860_v3 }
  0x5c   :  { %2695 = vmatprep.subr.mxu1 %v3860_v3  ;;  %2669 = vmatpush3.msra.mxu0 %v3284_v19 }
  0x5d   :  { %2696 = vmatpush3.msra.mxu1 %v3116_v17  ;;  %2670 = vmatprep.subr.mxu0 %v3860_v3 }
  0x5e   :  { %2697 = vmatprep.subr.mxu1 %v3860_v3  ;;  %2671 = vmatpush3.msra.mxu0 %v3304_v39 }
  0x5f   :  { %2698 = vmatpush3.msra.mxu1 %v3141_v25  ;;  %2672 = vmatprep.subr.mxu0 %v3860_v3 }
  0x60   :  { %2699 = vmatprep.subr.mxu1 %v3860_v3  ;;  %2673 = vmatpush3.msra.mxu0 %v3319_v58 }
  0x61   :  { %2700 = vmatpush3.msra.mxu1 %v3150_v28  ;;  %2674 = vmatprep.subr.mxu0 %v3860_v3 }
  0x62   :  { %2701 = vmatprep.subr.mxu1 %v3860_v3  ;;  %2675 = vmatpush3.msra.mxu0 %v3333_v52 }
  0x63   :  { %2702 = vmatpush3.msra.mxu1 %v3169_v35  ;;  %2676 = vmatprep.subr.mxu0 %v3860_v3 }
  0x64   :  { %2703 = vmatprep.subr.mxu1 %v3860_v3  ;;  %2677 = vmatpush3.msra.mxu0 %v3350_v7 }
  0x65   :  { %2704 = vmatpush3.msra.mxu1 %v3197_v45  ;;  %2678 = vmatprep.subr.mxu0 %v3860_v3 }
  0x66   :  { %2705 = vmatprep.subr.mxu1 %v3860_v3  ;;  %2679 = vmatpush3.msra.mxu0 %v3361_v36  ;;  %v797_v36 = vsub.f32 %v677_v42, %v715_v51 }
  0x67   :  { %2680 = vmatprep.mubr.msk.f32.mxu0 %vm3040_vm0, %v3860_v3  ;;  %2706 = vmatpush3.msra.mxu1 %v3207_v48 }
  0x68   :  { %2681 = vmatmul.mubr.f32.vlgmr.msra.gmra.mxu0 %v3252_v62  ;;  %2707 = vmatprep.subr.mxu1 %v3860_v3  ;;  %v798_v52 = vand.u32 4294901760, %v797_v36 }
  0x69   :  { %2715 = vmatprep.mubr.msk.f32.mxu1 %vm3040_vm0, %v3860_v3  ;;  %2708 = vmatpush3.msra.mxu1 %v3243_v59 }
  0x6a   :  { %2718 = vmatprep.subr.mxu0 %v3860_v3  ;;  %2709 = vmatprep.subr.mxu1 %v3860_v3  ;;  %v799_v39 = vsub.f32 %v797_v36, %v798_v52 }
  0x6b   :  { %2722 = vmatprep.mubr.msk.f32.mxu0 %vm3040_vm0, %v3860_v3  ;;  %2710 = vmatpush3.msra.mxu1 %v3256_v63 }
  0x6c   :  { %2711 = vmatprep.subr.mxu1 %v3860_v3  ;;  %2719 = vmatpush3.msra.mxu0 %v712_v26  ;;  %v800_v19 = vand.u32 4294901760, %v799_v39 }
  0x6d   :  { %2712 = vmatpush3.msra.mxu1 %v3277_v13  ;;  %2720 = vmatprep.subr.mxu0 %v3860_v3 }
  0x6e   :  { %2713 = vmatprep.subr.mxu1 %v3860_v3  ;;  %2721 = vmatpush3.msra.mxu0 %v715_v51 }
  0x6f   :  { %2714 = vmatpush3.msra.mxu1 %v3295_v32  ;;  %2732 = vmatprep.subr.mxu0 %v3860_v3 }
  0x70   :  { %2716 = vmatmul.mubr.f32.vlgmr.msra.gmra.mxu1 %v3252_v62  ;;  %2725 = vmatprep.subr.mxu1 %v3860_v3  ;;  %v791_v62 = vand.u32 4294901760, %v3545_v9 }
  0x71   :  { %2729 = vmatprep.mubr.msk.f32.mxu1 %vm3040_vm0, %v3860_v3 }
  0x72   :  { %v792_v7 = vsub.f32 %v3545_v9, %v791_v62 }
  0x74   :  { %v793_v58 = vand.u32 4294901760, %v792_v7 }
  0x76   :  { %2726 = vmatpush3.msra.mxu1 %v793_v58 }
  0x77   :  { %2727 = vmatprep.subr.mxu1 %v3860_v3 }
  0x78   :  { %2728 = vmatpush3.msra.mxu1 %v800_v19 }
  0x79   :  { %2739 = vmatprep.subr.mxu1 %v3860_v3 }
  0xe5   :  { %v122_v0 = vpop.f32.mrf.mxu0 }
  0xe7   :  { %v2542_v2 = vpop.f32.mrf.mxu0 }
  0xed   :  { %v273_v57 = vpop.f32.mrf.mxu1 }
  0xee   :  { %v274_v24 = vadd.f32 %v273_v57, %v122_v0  ;;  %v3900_v0 = vld [vmem:[#allocation12_spill] sm:$0xff] }
  0xef   :  { %v2577_v53 = vpop.f32.mrf.mxu1 }
 0x106   :  { %v377_v42 = vpop.f32.mrf.mxu0 }
 0x107   :  { %v378_v7 = vadd.f32 %v377_v42, %v274_v24  ;;  %v3893_v24 = vld [vmem:[#allocation13_spill] sm:$0xff] }
 0x108   :  { %v2612_v46 = vpop.f32.mrf.mxu0 }
 0x109   :  { %v3892_v46 = vmov 0.0  }
 0x10f   :  { %v466_v40 = vpop.f32.mrf.mxu1 }
 0x110   :  { %v467_v22 = vadd.f32 %v466_v40, %v378_v7  ;;  %v3898_v40 = vld [vmem:[#allocation24_spill] sm:$0xff] }
 0x111   :  { %v2647_v29 = vpop.f32.mrf.mxu1 }
 0x112   :  { %v3895_v29 = vld [vmem:[#allocation17_spill] sm:$0xff] }
 0x128   :  { %v585_v27 = vpop.f32.mrf.mxu0 }
 0x129   :  { %v586_v58 = vadd.f32 %v585_v27, %v467_v22  ;;  %v3894_v27 = vld [vmem:[#allocation15_spill] sm:$0xff] }
 0x12a   :  { %v2682_v23 = vpop.f32.mrf.mxu0 }
 0x130   :  { %v672_v39 = vpop.f32.mrf.mxu1 }
 0x131   :  { %v673_v50 = vadd.f32 %v672_v39, %v586_v58 }
 0x132   :  { %v2717_v19 = vpop.f32.mrf.mxu1 }
 0x133   :  { %v676_v54 = vmul.f32 0.125, %v673_v50 }
 0x135   :  { %v681_v3 = vsel %vm679_vm1, %v676_v54, 0 }
 0x136   :  { %v750_v2 = vand.u32 4294901760, %v681_v3 }
 0x138   :  { %v751_v41 = vsub.f32 %v681_v3, %v750_v2  ;;  %2730 = vmatmul.mubr.f32.vlgmr.msra.gmra.mxu1 %v750_v2 }
 0x139   :  { %2740 = vmatpush3.msra.mxu1 %v712_v26  ;;  %2743 = vmatprep.mubr.msk.f32.mxu1 %vm3040_vm0, %v3892_v46 }
 0x13a   :  { %2741 = vmatprep.subr.mxu1 %v3892_v46  ;;  %v752_v23 = vand.u32 4294901760, %v751_v41 }
 0x13b   :  { %2742 = vmatpush3.msra.mxu1 %v715_v51 }
 0x13c   :  { %2744 = vmatmul.mubr.f32.vlgmr.msra.gmra.mxu1 %v752_v23  ;;  %2753 = vmatprep.subr.mxu1 %v3892_v46  ;;  %v753_v22 = vsub.f32 %v751_v41, %v752_v23 }
 0x13d   :  { %2754 = vmatpush3.msra.mxu1 %v712_v26  ;;  %2757 = vmatprep.mubr.msk.f32.mxu1 %vm3040_vm0, %v3892_v46 }
 0x13e   :  { %2755 = vmatprep.subr.mxu1 %v3892_v46  ;;  %v754_v3 = vand.u32 4294901760, %v753_v22 }
 0x13f   :  { %2756 = vmatpush3.msra.mxu1 %v715_v51 }
 0x140   :  { %2723 = vmatmul.mubr.f32.vlgmr.msra.gmra.mxu0 %v754_v3  ;;  %2758 = vmatmul.mubr.f32.vlgmr.msra.gmra.mxu1 %v750_v2 }
 0x141   :  { %2733 = vmatpush3.msra.mxu0 %v3545_v9  ;;  %2736 = vmatprep.mubr.msk.f32.mxu0 %vm3040_vm0, %v3892_v46 }
 0x142   :  { %2734 = vmatprep.subr.mxu0 %v3892_v46  ;;  %2795 = vmatprep.subr.mxu1 %v3892_v46 }
 0x143   :  { %2735 = vmatpush3.msra.mxu0 %v797_v36  ;;  %2796 = vmatpush3.msra.mxu1 %v3175_v37  ;;  %v3896_v37 = vld [vmem:[#allocation19_spill] sm:$0xff] }
 0x144   :  { %2746 = vmatprep.subr.mxu0 %v3892_v46  ;;  %2737 = vmatmul.mubr.f32.vlgmr.msra.gmra.mxu0 %v751_v41 }
 0x145   :  { %2747 = vmatpush3.msra.mxu0 %v791_v62  ;;  %2750 = vmatprep.mubr.msk.f32.mxu0 %vm3040_vm0, %v3892_v46 }
 0x146   :  { %2748 = vmatprep.subr.mxu0 %v3892_v46  ;;  %2797 = vmatprep.subr.mxu1 %v3892_v46 }
 0x147   :  { %2749 = vmatpush3.msra.mxu0 %v798_v52  ;;  %2798 = vmatpush3.msra.mxu1 %v3177_v38  ;;  %v3897_v38 = vld [vmem:[#allocation21_spill] sm:$0xff] }
 0x148   :  { %2751 = vmatmul.mubr.f32.vlgmr.msra.gmra.mxu0 %v750_v2  ;;  %2799 = vmatprep.subr.mxu1 %v3892_v46 }
 0x149   :  { %2800 = vmatpush3.msra.mxu1 %v3195_v44  ;;  %2760 = vmatprep.subr.mxu0 %v3892_v46  ;;  %v3899_v44 = vld [vmem:[#allocation27_spill] sm:$0xff] }
 0x14a   :  { %2801 = vmatprep.subr.mxu1 %v3892_v46  ;;  %2761 = vmatpush3.msra.mxu0 %v3077_v4 }
 0x14b   :  { %2802 = vmatpush3.msra.mxu1 %v3893_v24  ;;  %2762 = vmatprep.subr.mxu0 %v3892_v46 }
 0x14c   :  { %2803 = vmatprep.subr.mxu1 %v3892_v46  ;;  %2763 = vmatpush3.msra.mxu0 %v3079_v5 }
 0x14d   :  { %2804 = vmatpush3.msra.mxu1 %v3894_v27  ;;  %2764 = vmatprep.subr.mxu0 %v3892_v46 }
 0x14e   :  { %2805 = vmatprep.subr.mxu1 %v3892_v46  ;;  %2765 = vmatpush3.msra.mxu0 %v3081_v6 }
 0x14f   :  { %2806 = vmatpush3.msra.mxu1 %v3895_v29  ;;  %2766 = vmatprep.subr.mxu0 %v3892_v46 }
 0x150   :  { %2807 = vmatprep.subr.mxu1 %v3892_v46  ;;  %2767 = vmatpush3.msra.mxu0 %v3093_v10 }
 0x151   :  { %2808 = vmatpush3.msra.mxu1 %v3896_v37  ;;  %2768 = vmatprep.subr.mxu0 %v3892_v46 }
 0x152   :  { %2809 = vmatprep.subr.mxu1 %v3892_v46  ;;  %2769 = vmatpush3.msra.mxu0 %v3095_v11 }
 0x153   :  { %2810 = vmatpush3.msra.mxu1 %v3897_v38  ;;  %2770 = vmatprep.subr.mxu0 %v3892_v46 }
 0x154   :  { %2811 = vmatprep.subr.mxu1 %v3892_v46  ;;  %2771 = vmatpush3.msra.mxu0 %v3097_v12 }
 0x155   :  { %2812 = vmatpush3.msra.mxu1 %v3898_v40  ;;  %2772 = vmatprep.subr.mxu0 %v3892_v46 }
 0x156   :  { %2813 = vmatprep.subr.mxu1 %v3892_v46  ;;  %2773 = vmatpush3.msra.mxu0 %v3116_v17 }
 0x157   :  { %2814 = vmatpush3.msra.mxu1 %v3899_v44  ;;  %2774 = vmatprep.subr.mxu0 %v3892_v46 }
 0x158   :  { %2815 = vmatprep.subr.mxu1 %v3892_v46  ;;  %2775 = vmatpush3.msra.mxu0 %v3141_v25 }
 0x159   :  { %2816 = vmatpush3.msra.mxu1 %v3342_v60  ;;  %2776 = vmatprep.subr.mxu0 %v3892_v46 }
 0x15a   :  { %2817 = vmatprep.subr.mxu1 %v3892_v46  ;;  %2777 = vmatpush3.msra.mxu0 %v3150_v28 }
 0x15b   :  { %2818 = vmatpush3.msra.mxu1 %v3356_v49  ;;  %2778 = vmatprep.subr.mxu0 %v3892_v46 }
 0x15c   :  { %2819 = vmatprep.subr.mxu1 %v3892_v46  ;;  %2779 = vmatpush3.msra.mxu0 %v3169_v35 }
 0x15d   :  { %2820 = vmatpush3.msra.mxu1 %v3367_v56  ;;  %2780 = vmatprep.subr.mxu0 %v3892_v46 }
 0x15e   :  { %2821 = vmatprep.subr.mxu1 %v3892_v46  ;;  %2781 = vmatpush3.msra.mxu0 %v3197_v45 }
 0x15f   :  { %2822 = vmatpush3.msra.mxu1 %v3375_v1  ;;  %2782 = vmatprep.subr.mxu0 %v3892_v46 }
 0x160   :  { %2823 = vmatprep.subr.mxu1 %v3892_v46  ;;  %2783 = vmatpush3.msra.mxu0 %v3207_v48 }
 0x161   :  { %2824 = vmatpush3.msra.mxu1 %v3382_v14  ;;  %2784 = vmatprep.subr.mxu0 %v3892_v46 }
 0x162   :  { %2825 = vmatprep.subr.mxu1 %v3892_v46  ;;  %2827 = vmatprep.mubr.msk.f32.mxu1 %vm3040_vm0, %v3892_v46 }
 0x163   :  { %2826 = vmatpush3.msra.mxu1 %v3388_v33  ;;  %2785 = vmatpush3.msra.mxu0 %v3243_v59 }
 0x164   :  { %2865 = vmatprep.subr.mxu1 %v3892_v46  ;;  %2786 = vmatprep.subr.mxu0 %v3892_v46 }
 0x165   :  { %2787 = vmatpush3.msra.mxu0 %v3256_v63  ;;  %2792 = vmatprep.mubr.msk.f32.mxu0 %vm3040_vm0, %v3892_v46 }
 0x166   :  { %2788 = vmatprep.subr.mxu0 %v3892_v46 }
 0x167   :  { %2789 = vmatpush3.msra.mxu0 %v3277_v13 }
 0x168   :  { %2790 = vmatprep.subr.mxu0 %v3892_v46 }
 0x169   :  { %2791 = vmatpush3.msra.mxu0 %v3295_v32 }
 0x16a   :  { %2830 = vmatprep.subr.mxu0 %v3892_v46 }
 0x1f8   :  { %v837_v50 = vpop.f32.mrf.mxu1 }
 0x1fa   :  { %v2731_v53 = vpop.f32.mrf.mxu1 }
 0x1fc   :  { %v988_v56 = vpop.f32.mrf.mxu1 }
 0x1fe   :  { %v2745_v57 = vpop.f32.mrf.mxu1 }
 0x200   :  { %v756_v41 = vpop.f32.mrf.mxu0  ;;  %v1138_v52 = vpop.f32.mrf.mxu1 }
 0x201   :  { %v838_v60 = vadd.f32 %v837_v50, %v756_v41 }
 0x202   :  { %v2724_v54 = vpop.f32.mrf.mxu0  ;;  %v2759_v1 = vpop.f32.mrf.mxu1 }
 0x204   :  { %v913_v49 = vpop.f32.mrf.mxu0 }
 0x205   :  { %v914_v36 = vadd.f32 %v913_v49, %v838_v60 }
 0x206   :  { %v2738_v14 = vpop.f32.mrf.mxu0 }
 0x207   :  { %v989_v33 = vadd.f32 %v988_v56, %v914_v36 }
 0x208   :  { %v1065_v26 = vpop.f32.mrf.mxu0 }
 0x209   :  { %v1066_v9 = vadd.f32 %v1065_v26, %v989_v33 }
 0x20a   :  { %v2752_v51 = vpop.f32.mrf.mxu0 }
 0x20b   :  { %v1139_v62 = vadd.f32 %v1138_v52, %v1066_v9 }
 0x20d   :  { %v3640_v42 = vsub.f32 %v3900_v0, %v1139_v62 }
 0x20f   :  { %v1143_v7 = vmul.f32 %v3640_v42, %v3640_v42 }
 0x211   :  { %v3644_v58 = vand.u32 4294901760, %v1143_v7 }
 0x213   :  { %2828 = vmatmul.mubr.f32.vlgmr.msra.gmra.mxu1 %v3644_v58  ;;  %v3648_v39 = vsub.f32 %v1143_v7, %v3644_v58 }
 0x214   :  { %2866 = vmatpush3.msra.mxu1 %v3077_v4  ;;  %2897 = vmatprep.mubr.msk.f32.mxu1 %vm3040_vm0, %v3892_v46 }
 0x215   :  { %2867 = vmatprep.subr.mxu1 %v3892_v46  ;;  %v1227_v19 = vand.u32 4294901760, %v3648_v39 }
 0x216   :  { %2868 = vmatpush3.msra.mxu1 %v3079_v5 }
 0x217   :  { %2869 = vmatprep.subr.mxu1 %v3892_v46  ;;  %v1228_v2 = vsub.f32 %v3648_v39, %v1227_v19 }
 0x218   :  { %2870 = vmatpush3.msra.mxu1 %v3081_v6 }
 0x219   :  { %2871 = vmatprep.subr.mxu1 %v3892_v46  ;;  %v1229_v23 = vand.u32 4294901760, %v1228_v2 }
 0x21a   :  { %2872 = vmatpush3.msra.mxu1 %v3093_v10 }
 0x21b   :  { %2873 = vmatprep.subr.mxu1 %v3892_v46  ;;  %2793 = vmatmul.mubr.f32.vlgmr.msra.gmra.mxu0 %v1229_v23 }
 0x21c   :  { %2831 = vmatpush3.msra.mxu0 %v3111_v15  ;;  %2874 = vmatpush3.msra.mxu1 %v3095_v11  ;;  %v3901_v15 = vld [vmem:[#allocation23_spill] sm:$0xff] }
 0x21d   :  { %2832 = vmatprep.subr.mxu0 %v3892_v46  ;;  %2875 = vmatprep.subr.mxu1 %v3892_v46 }
 0x21e   :  { %2833 = vmatpush3.msra.mxu0 %v3114_v16  ;;  %2876 = vmatpush3.msra.mxu1 %v3097_v12  ;;  %v3902_v16 = vld [vmem:[#allocation26_spill] sm:$0xff] }
 0x21f   :  { %2834 = vmatprep.subr.mxu0 %v3892_v46  ;;  %2877 = vmatprep.subr.mxu1 %v3892_v46 }
 0x220   :  { %2835 = vmatpush3.msra.mxu0 %v3119_v18  ;;  %2878 = vmatpush3.msra.mxu1 %v3116_v17  ;;  %v3910_v18 = vld [vmem:[#allocation11_spill] sm:$0xff] }
 0x221   :  { %2836 = vmatprep.subr.mxu0 %v3892_v46  ;;  %2879 = vmatprep.subr.mxu1 %v3892_v46 }
 0x222   :  { %2837 = vmatpush3.msra.mxu0 %v3126_v20  ;;  %2880 = vmatpush3.msra.mxu1 %v3141_v25  ;;  %v3911_v20 = vld [vmem:[#allocation14_spill] sm:$0xff] }
 0x223   :  { %2838 = vmatprep.subr.mxu0 %v3892_v46  ;;  %2881 = vmatprep.subr.mxu1 %v3892_v46 }
 0x224   :  { %2839 = vmatpush3.msra.mxu0 %v3129_v21  ;;  %2882 = vmatpush3.msra.mxu1 %v3150_v28  ;;  %v3912_v21 = vld [vmem:[#allocation16_spill] sm:$0xff] }
 0x225   :  { %2840 = vmatprep.subr.mxu0 %v3892_v46  ;;  %2883 = vmatprep.subr.mxu1 %v3892_v46 }
 0x226   :  { %2841 = vmatpush3.msra.mxu0 %v3156_v30  ;;  %2884 = vmatpush3.msra.mxu1 %v3169_v35  ;;  %v3915_v30 = vld [vmem:[#allocation22_spill] sm:$0xff] }
 0x227   :  { %2842 = vmatprep.subr.mxu0 %v3892_v46  ;;  %2885 = vmatprep.subr.mxu1 %v3892_v46 }
 0x228   :  { %2843 = vmatpush3.msra.mxu0 %v3166_v34  ;;  %2886 = vmatpush3.msra.mxu1 %v3197_v45  ;;  %v3916_v34 = vld [vmem:[#allocation25_spill] sm:$0xff] }
 0x229   :  { %2844 = vmatprep.subr.mxu0 %v3892_v46  ;;  %2887 = vmatprep.subr.mxu1 %v3892_v46 }
 0x22a   :  { %2845 = vmatpush3.msra.mxu0 %v3191_v43  ;;  %2888 = vmatpush3.msra.mxu1 %v3207_v48  ;;  %v3918_v43 = vld [vmem:[#allocation30_spill] sm:$0xff] }
 0x22b   :  { %2846 = vmatprep.subr.mxu0 %v3892_v46  ;;  %2889 = vmatprep.subr.mxu1 %v3892_v46 }
 0x22c   :  { %2847 = vmatpush3.msra.mxu0 %v3203_v47  ;;  %2890 = vmatpush3.msra.mxu1 %v3243_v59  ;;  %v1789_v47 = vld [vmem:[%s3832_s3 + $0x8] sm:$0xff] }
 0x22d   :  { %2848 = vmatprep.subr.mxu0 %v3892_v46  ;;  %2891 = vmatprep.subr.mxu1 %v3892_v46 }
 0x22e   :  { %2849 = vmatpush3.msra.mxu0 %v3230_v55  ;;  %2892 = vmatpush3.msra.mxu1 %v3256_v63  ;;  %v1822_v55 = vand.u32 4294901760, %v1789_v47 }
 0x22f   :  { %2850 = vmatprep.subr.mxu0 %v3892_v46  ;;  %2893 = vmatprep.subr.mxu1 %v3892_v46 }
 0x230   :  { %2851 = vmatpush3.msra.mxu0 %v3249_v61  ;;  %2894 = vmatpush3.msra.mxu1 %v3277_v13  ;;  %v1900_v61 = vsub.f32 %v1789_v47, %v1822_v55 }
 0x231   :  { %2852 = vmatprep.subr.mxu0 %v3892_v46  ;;  %2895 = vmatprep.subr.mxu1 %v3892_v46 }
 0x232   :  { %2853 = vmatpush3.msra.mxu0 %v3271_v8  ;;  %2896 = vmatpush3.msra.mxu1 %v3295_v32  ;;  %v1901_v8 = vand.u32 4294901760, %v1900_v61 }
 0x233   :  { %2854 = vmatprep.subr.mxu0 %v3892_v46  ;;  %2898 = vmatmul.mubr.f32.vlgmr.msra.gmra.mxu1 %v1227_v19 }
 0x234   :  { %2935 = vmatprep.subr.mxu1 %v3892_v46  ;;  %2855 = vmatpush3.msra.mxu0 %v3291_v31  ;;  %v1902_v31 = vsub.f32 %v1900_v61, %v1901_v8 }
 0x235   :  { %2936 = vmatpush3.msra.mxu1 %v3077_v4  ;;  %2856 = vmatprep.subr.mxu0 %v3892_v46  ;;  %v3903_v4 = vld [vmem:[#allocation29_spill] sm:$0xff] }
 0x236   :  { %2937 = vmatprep.subr.mxu1 %v3892_v46  ;;  %2857 = vmatpush3.msra.mxu0 %v3901_v15  ;;  %v1903_v22 = vand.u32 4294901760, %v1902_v31 }
 0x237   :  { %2938 = vmatpush3.msra.mxu1 %v3079_v5  ;;  %2858 = vmatprep.subr.mxu0 %v3892_v46  ;;  %v3904_v5 = vld [vmem:[#allocation5_spill] sm:$0xff] }
 0x238   :  { %2939 = vmatprep.subr.mxu1 %v3892_v46  ;;  %2859 = vmatpush3.msra.mxu0 %v3902_v16 }
 0x239   :  { %2940 = vmatpush3.msra.mxu1 %v3081_v6  ;;  %2860 = vmatprep.subr.mxu0 %v3892_v46  ;;  %v3905_v6 = vld [vmem:[#allocation6_spill] sm:$0xff] }
 0x23a   :  { %2941 = vmatprep.subr.mxu1 %v3892_v46  ;;  %2861 = vmatpush3.msra.mxu0 %v3903_v4 }
 0x23b   :  { %2862 = vmatprep.mubr.msk.f32.mxu0 %vm3040_vm0, %v3892_v46  ;;  %2942 = vmatpush3.msra.mxu1 %v3093_v10  ;;  %v3906_v10 = vld [vmem:[#allocation7_spill] sm:$0xff] }
 0x23c   :  { %2863 = vmatmul.mubr.f32.vlgmr.msra.gmra.mxu0 %v3648_v39  ;;  %2900 = vmatprep.subr.mxu0 %v3892_v46 }
 0x23d   :  { %2943 = vmatprep.subr.mxu1 %v3892_v46  ;;  %2901 = vmatpush3.msra.mxu0 %v3904_v5 }
 0x23e   :  { %2944 = vmatpush3.msra.mxu1 %v3095_v11  ;;  %2902 = vmatprep.subr.mxu0 %v3892_v46  ;;  %v3907_v11 = vld [vmem:[#allocation8_spill] sm:$0xff] }
 0x23f   :  { %2945 = vmatprep.subr.mxu1 %v3892_v46  ;;  %2903 = vmatpush3.msra.mxu0 %v3905_v6 }
 0x240   :  { %2946 = vmatpush3.msra.mxu1 %v3097_v12  ;;  %2904 = vmatprep.subr.mxu0 %v3892_v46  ;;  %v3908_v12 = vld [vmem:[#allocation9_spill] sm:$0xff] }
 0x241   :  { %2947 = vmatprep.subr.mxu1 %v3892_v46  ;;  %2905 = vmatpush3.msra.mxu0 %v3906_v10 }
 0x242   :  { %2948 = vmatpush3.msra.mxu1 %v3116_v17  ;;  %2906 = vmatprep.subr.mxu0 %v3892_v46  ;;  %v3909_v17 = vld [vmem:[#allocation10_spill] sm:$0xff] }
 0x243   :  { %2949 = vmatprep.subr.mxu1 %v3892_v46  ;;  %2907 = vmatpush3.msra.mxu0 %v3907_v11 }
 0x244   :  { %2950 = vmatpush3.msra.mxu1 %v3141_v25  ;;  %2908 = vmatprep.subr.mxu0 %v3892_v46  ;;  %v3913_v25 = vld [vmem:[#allocation18_spill] sm:$0xff] }
 0x245   :  { %2951 = vmatprep.subr.mxu1 %v3892_v46  ;;  %2909 = vmatpush3.msra.mxu0 %v3908_v12 }
 0x246   :  { %2952 = vmatpush3.msra.mxu1 %v3150_v28  ;;  %2910 = vmatprep.subr.mxu0 %v3892_v46  ;;  %v3914_v28 = vld [vmem:[#allocation20_spill] sm:$0xff] }
 0x247   :  { %2953 = vmatprep.subr.mxu1 %v3892_v46  ;;  %2911 = vmatpush3.msra.mxu0 %v3909_v17 }
 0x248   :  { %2954 = vmatpush3.msra.mxu1 %v3169_v35  ;;  %2912 = vmatprep.subr.mxu0 %v3892_v46  ;;  %v3917_v35 = vld [vmem:[#allocation28_spill] sm:$0xff] }
 0x249   :  { %2955 = vmatprep.subr.mxu1 %v3892_v46  ;;  %2913 = vmatpush3.msra.mxu0 %v3910_v18 }
 0x24a   :  { %2956 = vmatpush3.msra.mxu1 %v3197_v45  ;;  %2914 = vmatprep.subr.mxu0 %v3892_v46  ;;  %v3919_v45 = vld [vmem:[#allocation31_spill] sm:$0xff] }
 0x24b   :  { %2957 = vmatprep.subr.mxu1 %v3892_v46  ;;  %2915 = vmatpush3.msra.mxu0 %v3911_v20 }
 0x24c   :  { %2958 = vmatpush3.msra.mxu1 %v3207_v48  ;;  %2916 = vmatprep.subr.mxu0 %v3892_v46  ;;  %v1788_v48 = vld [vmem:[%s3832_s3] sm:$0xff]  ;;  %s3041_s3 = smov [#allocation2]  }
 0x24d   :  { %2959 = vmatprep.subr.mxu1 %v3892_v46  ;;  %2917 = vmatpush3.msra.mxu0 %v3912_v21  ;;  %s2260_s28 = sshll.u32 %s3041_s3, 4  ;;  %s2261_s28 = int_to_ptr.vmem [resolvable:$true] %s2260_s28 }
 0x24e   :  { %2960 = vmatpush3.msra.mxu1 %v3243_v59  ;;  %2918 = vmatprep.subr.mxu0 %v3892_v46  ;;  %v1825_v59 = vand.u32 4294901760, %v1788_v48  ;;  %s3017_s29 = scalar_lea.vmem %s2261_s28, 64  ;;  %p3022_p1 = scmp.lt.s32.totalorder %s2261_s28, %s2261_s28 }
 0x24f   :  { %2961 = vmatprep.subr.mxu1 %v3892_v46  ;;  %2919 = vmatpush3.msra.mxu0 %v3913_v25  ;;  %p3018_p0 = scmp.ne.s32.totalorder %s2261_s28, %s3017_s29  ;;  %p3023_p2 = scmp.lt.s32.totalorder %s3017_s29, %s3017_s29 }
 0x250   :  { %2962 = vmatpush3.msra.mxu1 %v3256_v63  ;;  %2920 = vmatprep.subr.mxu0 %v3892_v46  ;;  %v3801_v63 = vsub.f32 %v1788_v48, %v1825_v59 }
 0x251   :  { %2963 = vmatprep.subr.mxu1 %v3892_v46  ;;  %2921 = vmatpush3.msra.mxu0 %v3914_v28  ;;  %p3024_p3 = por %p3023_p2, %p3022_p1 }
 0x252   :  { %2964 = vmatpush3.msra.mxu1 %v3277_v13  ;;  %2922 = vmatprep.subr.mxu0 %v3892_v46  ;;  %v1908_v13 = vand.u32 4294901760, %v3801_v63 }
 0x253   :  { %2965 = vmatprep.subr.mxu1 %v3892_v46  ;;  %2923 = vmatpush3.msra.mxu0 %v3915_v30  ;;  %p3025_p4 = pnand %p3024_p3, %p3018_p0 }
 0x254   :  { %2966 = vmatpush3.msra.mxu1 %v3295_v32  ;;  %2967 = vmatprep.mubr.msk.f32.mxu1 %vm3040_vm0, %v3892_v46  ;;  %v1909_v32 = vsub.f32 %v3801_v63, %v1908_v13 }
 0x255   :  { %2924 = vmatprep.subr.mxu0 %v3892_v46  ;;  %2968 = vmatmul.mubr.f32.vlgmr.msra.gmra.mxu1 %v3644_v58 }
 0x256   :  { %2925 = vmatpush3.msra.mxu0 %v3916_v34  ;;  %2932 = vmatprep.mubr.msk.f32.mxu0 %vm3040_vm0, %v3892_v46  ;;  %v1910_v3 = vand.u32 4294901760, %v1909_v32 }
 0x257   :  { %2926 = vmatprep.subr.mxu0 %v3892_v46  ;;  %2977 = vmatprep.subr.mxu1 %v3892_v46 }
 0x258   :  { %2927 = vmatpush3.msra.mxu0 %v3917_v35  ;;  %2981 = vmatprep.mubr.msk.f32.mxu1 %vm3040_vm0, %v3892_v46 }
 0x259   :  { %2928 = vmatprep.subr.mxu0 %v3892_v46  ;;  %2978 = vmatpush3.msra.mxu1 %v1903_v22 }
 0x25a   :  { %2929 = vmatpush3.msra.mxu0 %v3918_v43  ;;  %2979 = vmatprep.subr.mxu1 %v3892_v46 }
 0x25b   :  { %2930 = vmatprep.subr.mxu0 %v3892_v46  ;;  %2980 = vmatpush3.msra.mxu1 %v1910_v3 }
 0x25c   :  { %2931 = vmatpush3.msra.mxu0 %v3919_v45  ;;  %2991 = vmatprep.subr.mxu1 %v3892_v46 }
 0x25d   :  { %2933 = vmatmul.mubr.f32.vlgmr.msra.gmra.mxu0 %v3644_v58  ;;  %2970 = vmatprep.subr.mxu0 %v3892_v46 }
 0x25e   :  { %2974 = vmatprep.mubr.msk.f32.mxu0 %vm3040_vm0, %v3892_v46  ;;  %2971 = vmatpush3.msra.mxu0 %v1822_v55 }
 0x25f   :  { %2972 = vmatprep.subr.mxu0 %v3892_v46 }
 0x260   :  { %2973 = vmatpush3.msra.mxu0 %v1825_v59 }
 0x261   :  { %2984 = vmatprep.subr.mxu0 %v3892_v46 }
 0x2d3   :  { %v1382_v24 = vpop.f32.mrf.mxu1 }
 0x2d5   :  { %v2829_v27 = vpop.f32.mrf.mxu1 }
 0x2db   :  { %v1231_v29 = vpop.f32.mrf.mxu0 }
 0x2dc   :  { %v1383_v56 = vadd.f32 %v1382_v24, %v1231_v29 }
 0x2dd   :  { %v2794_v37 = vpop.f32.mrf.mxu0 }
 0x2f3   :  { %v1575_v38 = vpop.f32.mrf.mxu1 }
 0x2f5   :  { %v2899_v40 = vpop.f32.mrf.mxu1 }
 0x2fc   :  { %v1486_v44 = vpop.f32.mrf.mxu0 }
 0x2fd   :  { %v1487_v41 = vadd.f32 %v1486_v44, %v1383_v56 }
 0x2fe   :  { %v2864_v50 = vpop.f32.mrf.mxu0 }
 0x2ff   :  { %v1576_v52 = vadd.f32 %v1575_v38, %v1487_v41 }
 0x315   :  { %v1781_v53 = vpop.f32.mrf.mxu1 }
 0x317   :  { %v2969_v57 = vpop.f32.mrf.mxu1 }
 0x31d   :  { %v1694_v54 = vpop.f32.mrf.mxu0 }
 0x31e   :  { %v1695_v1 = vadd.f32 %v1694_v54, %v1576_v52 }
 0x31f   :  { %v2934_v60 = vpop.f32.mrf.mxu0 }
 0x320   :  { %v1782_v49 = vadd.f32 %v1781_v53, %v1695_v1 }
 0x322   :  { %v1785_v36 = vmul.f32 0.125, %v1782_v49 }
 0x324   :  { %v1786_v14 = vadd.f32 1e-05, %v1785_v36 }
 0x326   :  { %3015 = vrsqrt.f32 %v1786_v14 }
 0x333   :  { %v3016_v33 = vpop.eup %3015 }
 0x334   :  { %v1791_v26 = vsel %vm679_vm1, %v3016_v33, 0 }
 0x335   :  { %v1860_v9 = vand.u32 4294901760, %v1791_v26 }
 0x337   :  { %v1861_v51 = vsub.f32 %v1791_v26, %v1860_v9  ;;  %2982 = vmatmul.mubr.f32.vlgmr.msra.gmra.mxu1 %v1860_v9 }
 0x338   :  { %2992 = vmatpush3.msra.mxu1 %v1822_v55  ;;  %2995 = vmatprep.mubr.msk.f32.mxu1 %vm3040_vm0, %v3892_v46 }
 0x339   :  { %2993 = vmatprep.subr.mxu1 %v3892_v46  ;;  %v1862_v62 = vand.u32 4294901760, %v1861_v51 }
 0x33a   :  { %2994 = vmatpush3.msra.mxu1 %v1825_v59 }
 0x33b   :  { %2996 = vmatmul.mubr.f32.vlgmr.msra.gmra.mxu1 %v1862_v62  ;;  %3005 = vmatprep.subr.mxu1 %v3892_v46  ;;  %v1863_v0 = vsub.f32 %v1861_v51, %v1862_v62 }
 0x33c   :  { %3006 = vmatpush3.msra.mxu1 %v1822_v55  ;;  %3009 = vmatprep.mubr.msk.f32.mxu1 %vm3040_vm0, %v3892_v46 }
 0x33d   :  { %3007 = vmatprep.subr.mxu1 %v3892_v46  ;;  %v1864_v7 = vand.u32 4294901760, %v1863_v0 }
 0x33e   :  { %3008 = vmatpush3.msra.mxu1 %v1825_v59 }
 0x33f   :  { %2975 = vmatmul.mubr.f32.vlgmr.msra.gmra.mxu0 %v1864_v7  ;;  %3010 = vmatmul.mubr.f32.vlgmr.msra.gmra.mxu1 %v1860_v9 }
 0x340   :  { %2985 = vmatpush3.msra.mxu0 %v1900_v61  ;;  %2988 = vmatprep.mubr.msk.f32.mxu0 %vm3040_vm0, %v3892_v46 }
 0x341   :  { %2986 = vmatprep.subr.mxu0 %v3892_v46 }
 0x342   :  { %2987 = vmatpush3.msra.mxu0 %v3801_v63 }
 0x343   :  { %2998 = vmatprep.subr.mxu0 %v3892_v46  ;;  %2989 = vmatmul.mubr.f32.vlgmr.msra.gmra.mxu0 %v1861_v51 }
 0x344   :  { %2999 = vmatpush3.msra.mxu0 %v1901_v8  ;;  %3002 = vmatprep.mubr.msk.f32.mxu0 %vm3040_vm0, %v3892_v46 }
 0x345   :  { %3000 = vmatprep.subr.mxu0 %v3892_v46 }
 0x346   :  { %3001 = vmatpush3.msra.mxu0 %v1908_v13 }
 0x347   :  { %3003 = vmatmul.mubr.f32.vlgmr.msra.gmra.mxu0 %v1860_v9 }
 0x3f7   :  { %v1947_v58 = vpop.f32.mrf.mxu1 }
 0x3f9   :  { %v2983_v39 = vpop.f32.mrf.mxu1 }
 0x3fb   :  { %v2098_v19 = vpop.f32.mrf.mxu1 }
 0x3fd   :  { %v2997_v2 = vpop.f32.mrf.mxu1 }
 0x3ff   :  { %v1866_v23 = vpop.f32.mrf.mxu0  ;;  %v2248_v15 = vpop.f32.mrf.mxu1 }
 0x400   :  { %v1948_v5 = vadd.f32 %v1947_v58, %v1866_v23 }
 0x401   :  { %v2976_v16 = vpop.f32.mrf.mxu0  ;;  %v3011_v4 = vpop.f32.mrf.mxu1 }
 0x403   :  { %v2023_v6 = vpop.f32.mrf.mxu0 }
 0x404   :  { %v2024_v10 = vadd.f32 %v2023_v6, %v1948_v5 }
 0x405   :  { %v2990_v11 = vpop.f32.mrf.mxu0 }
 0x406   :  { %v2099_v12 = vadd.f32 %v2098_v19, %v2024_v10 }
 0x407   :  { %v2175_v17 = vpop.f32.mrf.mxu0 }
 0x408   :  { %v2176_v18 = vadd.f32 %v2175_v17, %v2099_v12 }
 0x409   :  { %v3004_v20 = vpop.f32.mrf.mxu0 }
 0x40a   :  { %v2249_v46 = vadd.f32 %v2248_v15, %v2176_v18 }
 0x40c   :  { %v2252_v21 = vmul.f32 %v2249_v46, %v3640_v42 }
 0x40e   :  { %2253 = vst [vmem:[#allocation2] sm:$0xf] %v2252_v21 }
 0x40f   :  { %3028 = shalt.err (!%p3025_p4)
}
 0x410   :  { %2263 = dma.vmem_to_hbm [thread:$0]  %s2261_s28, 64, %s3833_s4, [#allocation3]  }
 0x411   :  { %3037 = dma.done.wait [#allocation3], 64  }
 0x412   :  { %3038 = vsyncadd [#allocation3], 4294967232 }
 0x413   :  { %2267 = vsyncpa [#allocation3], 1 }

</bundles_post_ra>
